<compile_context>
chip_gen: v7x
topology: tpu7x:2x2x1
jax: 0.10.0
libtpu: 0.0.40
codegen_flags: <defaults>
</compile_context>

<pallas_src>
import functools

import jax
import jax.numpy as jnp
from jax.experimental import pallas as pl
from jax.experimental.pallas import tpu as pltpu


def _shift_gt(gt, axis, d):
    """One-pixel shifted copy of the int32 label map along `axis`.

    d = +1 -> value of the neighbor at index i-1; d = -1 -> neighbor at i+1.
    Pixels whose neighbor falls outside the image get the sentinel -1, so a
    compare against any class id >= 0 is False (zero border for both binary
    dilation and binary erosion, matching scipy/cupy defaults).
    """
    n = gt.shape[axis]
    rolled = pltpu.roll(gt, shift=d % n, axis=axis)
    idx = jax.lax.broadcasted_iota(jnp.int32, gt.shape, axis)
    border = 0 if d == 1 else n - 1
    return jnp.where(idx == border, jnp.int32(-1), rolled)


def _bits_for_plane(v, plane):
    """Per-pixel bit 1 << (v - 32*plane) for labels in [32*plane, 32*plane+32).

    Out-of-range labels (the -1 border sentinel, ignore labels such as 255)
    contribute 0, so they never set a class bit (guards the shift amount too).
    """
    lo = plane * 32
    in_plane = (v >= lo) & (v < lo + 32)
    amt = jnp.where(in_plane, v - lo, 0)
    bit = jnp.left_shift(jnp.int32(1), amt)
    return jnp.where(in_plane, bit, jnp.int32(0))


def _bpkd_kernel(gt_ref, s_ref, t_ref, le_ref, lb_ref, nbh_ref, erogt_ref, *,
                 temperature, n_planes):
    c_idx = pl.program_id(1)
    cls = c_idx + 1                     # class 0 is skipped (contributes 0)

    gt = gt_ref[0, 0]                   # (H, W) int32

    @pl.when(c_idx == 0)
    def _per_batch_init():
        # Fresh per-batch partial accumulators (lane-dense (1, 8, 128) blocks).
        le_ref[...] = jnp.zeros_like(le_ref)
        lb_ref[...] = jnp.zeros_like(lb_ref)
        # One-pixel shifted label maps (zero border via the -1 sentinel).
        n_up = _shift_gt(gt, 0, 1)      # gt[i-1, j]
        n_dn = _shift_gt(gt, 0, -1)     # gt[i+1, j]
        n_lt = _shift_gt(gt, 1, 1)      # gt[i, j-1]
        n_rt = _shift_gt(gt, 1, -1)     # gt[i, j+1]
        # Erosion plane: erosion of (gt == cls) is exactly (ero_gt == cls).
        same_all = (n_up == gt) & (n_dn == gt) & (n_lt == gt) & (n_rt == gt)
        erogt_ref[...] = jnp.where(same_all, gt, jnp.int32(-1))
        # Dilation planes: 5-neighborhood class bitmask (32 classes / plane).
        for p in range(n_planes):
            nbh = _bits_for_plane(gt, p)
            for nm in (n_up, n_dn, n_lt, n_rt):
                nbh = nbh | _bits_for_plane(nm, p)
            nbh_ref[p] = nbh

    inv_tau = jnp.float32(1.0 / temperature)
    s_tau = s_ref[0, 0].astype(jnp.float32) * inv_tau
    t_tau = t_ref[0, 0].astype(jnp.float32) * inv_tau

    # ---- shared softmax pieces (used by both the edge and the body term) ----
    # Masked-out logits are exactly 0, so max(max(x), 0) upper-bounds the
    # masked max for any mask: the exponentials never overflow.
    mt = jnp.maximum(jnp.max(t_tau, keepdims=True), 0.0)     # (1, 1)
    ms = jnp.maximum(jnp.max(s_tau, keepdims=True), 0.0)     # (1, 1)
    zt = t_tau - mt
    zs = s_tau - ms
    et = jnp.exp(zt)
    es = jnp.exp(zs)
    prod = et * (zt - zs)
    emt = jnp.exp(-mt)                  # value of et at a masked-out pixel
    ems = jnp.exp(-ms)                  # value of es at a masked-out pixel
    prod0 = emt * (ms - mt)             # value of prod at a masked-out pixel

    # ---- per-class masks from the class-independent precomputed planes ----
    ero = erogt_ref[...] == cls                          # binary_erosion
    if n_planes == 1:
        nbh = nbh_ref[0]
    else:
        nbh = nbh_ref[cls // 32]                         # dynamic plane index
    bit = jnp.left_shift(jnp.int32(1), cls % 32)         # scalar class bit
    dil = (nbh & bit) != 0                               # binary_dilation
    edges = dil & (~ero)                  # dil ^ ero (ero is a subset of dil)
    # bodies == (~edges) & mask == ero exactly.

    def masked_cwd_term(mask):
        """sum_j pt_j (log pt_j - log ps_j) with xt/xs = mask * {t,s}_tau."""
        st = jnp.sum(jnp.where(mask, et, emt), keepdims=True)
        ss = jnp.sum(jnp.where(mask, es, ems), keepdims=True)
        num = jnp.sum(jnp.where(mask, prod, prod0), keepdims=True)
        return num / st + (jnp.log(ss) - jnp.log(st))

    le_ref[...] += masked_cwd_term(edges)
    lb_ref[...] += masked_cwd_term(ero)


def _physical_vmem_bytes():
    """Per-core physical VMEM; 64 MiB fallback (v7x floor, safe everywhere)."""
    try:
        cap = getattr(pltpu.get_tpu_info(), "vmem_capacity_bytes", None)
        if cap:
            return int(cap)
    except Exception:
        pass
    return 64 << 20


def bpkd_loss(preds_S, preds_T, gt_labels, *, temperature=1.0,
              num_classes=None, edge_weight=500.0, body_weight=200.0,
              loss_weight=1.0):
    B, C, H, W = preds_S.shape
    if num_classes is None:
        num_classes = C
    assert num_classes == C, "preds must have one channel per class"
    if gt_labels.ndim == 3:
        gt_labels = gt_labels[:, None]
    gt_labels = gt_labels.astype(jnp.int32)

    if C <= 1:  # only the (all-zero) class 0 exists -> both losses are 0
        zero = jnp.zeros((), jnp.float32)
        return dict(loss_edges=zero, loss_bodies=zero)

    n_planes = -(-C // 32)              # 32 class bits per bitmask plane
    kernel = functools.partial(_bpkd_kernel, temperature=temperature,
                               n_planes=n_planes)

    # VMEM budget: double-buffered (gt + S + T) blocks, the class-independent
    # scratch planes, plus headroom for the full-tile f32 temporaries of the
    # shared-softmax chain (zt, zs, et, es, prod and the masked selects at the
    # reduction boundaries).  Clamped to ~7/8 of the physical VMEM (v5e/v6e:
    # 128 MiB, v7x: 64 MiB per core) so large tiles keep full double buffering
    # wherever they fit, without over-subscribing v7x.
    hp = -(-H // 8) * 8
    wp = -(-W // 128) * 128
    tile_px = hp * wp
    s_item = jnp.dtype(preds_S.dtype).itemsize
    t_item = jnp.dtype(preds_T.dtype).itemsize
    block_bytes = tile_px * (4 + s_item + t_item)
    scratch_bytes = (n_planes + 1) * tile_px * 4
    temp_bytes = 6 * tile_px * 4
    need = 2 * block_bytes + scratch_bytes + temp_bytes + (2 << 20)
    vmem_cap = _physical_vmem_bytes() * 7 // 8
    vmem_limit = int(min(max(need, 32 << 20), vmem_cap))
    # TODO(synk): for megapixel H*W tiles whose footprint exceeds v7x's 64 MiB
    # VMEM, add an innermost W-tiling grid axis with online st/ss/num
    # accumulators (keeping the int planes at full (H, W) for the 1-px halo).
    # TODO(synk): when B < number of TensorCores (e.g. B == 1 on v7x), split
    # the class axis into a small "parallel" axis so both cores get work.

    grid_spec = pltpu.PrefetchScalarGridSpec(
        num_scalar_prefetch=0,
        grid=(B, C - 1),                                   # class 0 skipped
        in_specs=[
            # gt's block index is constant across the class axis, so its
            # re-fetch is elided by the pipeline after the first class step.
            pl.BlockSpec((1, 1, H, W), lambda b, c: (b, 0, 0, 0)),      # gt
            pl.BlockSpec((1, 1, H, W), lambda b, c: (b, c + 1, 0, 0)),  # preds_S
            pl.BlockSpec((1, 1, H, W), lambda b, c: (b, c + 1, 0, 0)),  # preds_T
        ],
        out_specs=[
            pl.BlockSpec((1, 8, 128), lambda b, c: (b, 0, 0)),   # edge partials
            pl.BlockSpec((1, 8, 128), lambda b, c: (b, 0, 0)),   # body partials
        ],
        scratch_shapes=[
            pltpu.VMEM((n_planes, H, W), jnp.int32),   # neighborhood bitmask
            pltpu.VMEM((H, W), jnp.int32),             # erosion label plane
        ],
    )

    le_part, lb_part = pl.pallas_call(
        kernel,
        out_shape=(jax.ShapeDtypeStruct((B, 8, 128), jnp.float32),
                   jax.ShapeDtypeStruct((B, 8, 128), jnp.float32)),
        grid_spec=grid_spec,
        compiler_params=pltpu.CompilerParams(
            dimension_semantics=("parallel", "arbitrary"),
            vmem_limit_bytes=vmem_limit),
    )(gt_labels, preds_S, preds_T)

    # Final scale / reduction over the batch in plain JAX.  Matches the module:
    # the inner ChannelWiseDivergence is applied per batch element (N == 1 ->
    # divide by num_classes only); the batch sum is then divided by B once.
    scale = loss_weight * (temperature ** 2) / (num_classes * B)
    loss_edges = edge_weight * scale * jnp.sum(le_part[:, 0, 0])
    loss_bodies = body_weight * scale * jnp.sum(lb_part[:, 0, 0])
    return dict(loss_edges=loss_edges, loss_bodies=loss_bodies)


# ---------------- pure-JAX reference (matches the PyTorch module) ------------
def _ref_shift(m, axis, d):
    n = m.shape[axis]
    rolled = jnp.roll(m, d, axis=axis)
    idx = jnp.arange(n)
    border = 0 if d == 1 else n - 1
    keep = idx != border
    shape = [1] * m.ndim
    shape[axis] = n
    return rolled & keep.reshape(shape)


def bpkd_reference(preds_S, preds_T, gt_labels, *, temperature=1.0,
                   edge_weight=500.0, body_weight=200.0, loss_weight=1.0):
    """Pure-JAX port of BPKDV3.forward (per-batch CWD with N == 1)."""
    B, C, H, W = preds_S.shape
    gt = gt_labels[:, 0]
    cls = jnp.arange(C)
    m = gt[:, None, :, :] == cls[None, :, None, None]
    m = m & (cls[None, :, None, None] > 0)

    up = _ref_shift(m, 2, 1)
    down = _ref_shift(m, 2, -1)
    left = _ref_shift(m, 3, 1)
    right = _ref_shift(m, 3, -1)
    dil = m | up | down | left | right
    ero = m & up & down & left & right
    edges = dil ^ ero
    bodies = (~edges) & m

    def per_batch_cwd(ps, pt):
        s = ps.reshape(B, C, H * W) / temperature
        t = pt.reshape(B, C, H * W) / temperature
        pT = jax.nn.softmax(t, axis=-1)
        per_bc = jnp.sum(pT * (jax.nn.log_softmax(t, axis=-1)
                               - jax.nn.log_softmax(s, axis=-1)), axis=(1, 2))
        return per_bc * (temperature ** 2) / C          # (B,)  N == 1 each

    ef = edges.astype(jnp.float32)
    bf = bodies.astype(jnp.float32)
    ce = per_batch_cwd(preds_S * ef, preds_T * ef)
    cb = per_batch_cwd(preds_S * bf, preds_T * bf)
    loss_edges = loss_weight * edge_weight * jnp.sum(ce) / B
    loss_bodies = loss_weight * body_weight * jnp.sum(cb) / B
    return dict(loss_edges=loss_edges, loss_bodies=loss_bodies)


if __name__ == "__main__":
    key = jax.random.PRNGKey(0)
    k1, k2, k3 = jax.random.split(key, 3)

    # Small shapes consistent with the module (segmentation logits: one
    # channel per class, small spatial map kept lane-aligned on the last dim).
    B, C, H, W = 2, 4, 16, 128
    preds_S = jax.random.normal(k1, (B, C, H, W), jnp.float32)
    preds_T = jax.random.normal(k2, (B, C, H, W), jnp.float32)
    gt_labels = jax.random.randint(k3, (B, 1, H, W), 0, C, jnp.int32)

    out = bpkd_loss(preds_S, preds_T, gt_labels, num_classes=C)
    jax.block_until_ready(out)

    ref = bpkd_reference(preds_S, preds_T, gt_labels)
    for name in ("loss_edges", "loss_bodies"):
        assert jnp.allclose(out[name], ref[name], rtol=2e-3, atol=1e-3), (
            name, float(out[name]), float(ref[name]))

    print("KERNEL_OK")
</pallas_src>

<mosaic_0001>
module attributes {stable_mosaic.version = 11 : i64} {
  func.func @_bpkd_kernel(%arg0: i32, %arg1: i32, %arg2: memref<1x1x16x128xi32, #tpu.memory_space<vmem>>, %arg3: memref<1x1x16x128xf32, #tpu.memory_space<vmem>>, %arg4: memref<1x1x16x128xf32, #tpu.memory_space<vmem>>, %arg5: memref<1x8x128xf32, #tpu.memory_space<vmem>>, %arg6: memref<1x8x128xf32, #tpu.memory_space<vmem>>, %arg7: memref<1x16x128xi32, #tpu.memory_space<vmem>>, %arg8: memref<16x128xi32, #tpu.memory_space<vmem>>) attributes {dimension_semantics = [#tpu.dimension_semantics<parallel>, #tpu.dimension_semantics<arbitrary>], iteration_bounds = array<i64: 2, 3>, scalar_prefetch = 0 : i64, scratch_operands = 2 : i64, tpu.core_type = #tpu.core_type<tc>, window_params = [{transform_indices = @transform_0, window_bounds = array<i64: 1, 1, 16, 128>}, {transform_indices = @transform_1, window_bounds = array<i64: 1, 1, 16, 128>}, {transform_indices = @transform_2, window_bounds = array<i64: 1, 1, 16, 128>}, {transform_indices = @transform_3, window_bounds = array<i64: 1, 8, 128>}, {transform_indices = @transform_4, window_bounds = array<i64: 1, 8, 128>}]} {
    %c1_i32 = arith.constant 1 : i32
    %0 = arith.addi %arg1, %c1_i32 : i32
    %c0 = arith.constant 0 : index
    %c0_0 = arith.constant 0 : index
    %c0_1 = arith.constant 0 : index
    %c0_2 = arith.constant 0 : index
    %1 = vector.load %arg2[%c0, %c0_0, %c0_1, %c0_2] : memref<1x1x16x128xi32, #tpu.memory_space<vmem>>, vector<1x1x16x128xi32>
    %2 = vector.shape_cast %1 : vector<1x1x16x128xi32> to vector<16x128xi32>
    %c0_i32 = arith.constant 0 : i32
    %3 = arith.cmpi eq, %arg1, %c0_i32 : i32
    %4 = arith.extui %3 : i1 to i32
    %c0_i32_3 = arith.constant 0 : i32
    %5 = arith.cmpi ne, %4, %c0_i32_3 : i32
    scf.if %5 {
      %cst_50 = arith.constant 0.000000e+00 : f32
      %134 = vector.broadcast %cst_50 : f32 to vector<1x8x128xf32>
      %c0_51 = arith.constant 0 : index
      %c0_52 = arith.constant 0 : index
      %c0_53 = arith.constant 0 : index
      %135 = vector.load %arg5[%c0_51, %c0_52, %c0_53] : memref<1x8x128xf32, #tpu.memory_space<vmem>>, vector<1x8x128xf32>
      tpu.vector_store %arg5[%c0_51, %c0_52, %c0_53], %134 {strides = array<i32>} : memref<1x8x128xf32, #tpu.memory_space<vmem>>, vector<1x8x128xf32>,
      %cst_54 = arith.constant 0.000000e+00 : f32
      %136 = vector.broadcast %cst_54 : f32 to vector<1x8x128xf32>
      %c0_55 = arith.constant 0 : index
      %c0_56 = arith.constant 0 : index
      %c0_57 = arith.constant 0 : index
      %137 = vector.load %arg6[%c0_55, %c0_56, %c0_57] : memref<1x8x128xf32, #tpu.memory_space<vmem>>, vector<1x8x128xf32>
      tpu.vector_store %arg6[%c0_55, %c0_56, %c0_57], %136 {strides = array<i32>} : memref<1x8x128xf32, #tpu.memory_space<vmem>>, vector<1x8x128xf32>,
      %c1_i32_58 = arith.constant 1 : i32
      %138 = tpu.dynamic_rotate %2 by %c1_i32_58 dim 0 : vector<16x128xi32>, i32 -> vector<16x128xi32>
      %139 = tpu.iota {dimensions = array<i32: 0>} : vector<16x128xi32>
      %c0_i32_59 = arith.constant 0 : i32
      %140 = vector.broadcast %c0_i32_59 : i32 to vector<16x128xi32>
      %141 = arith.cmpi eq, %139, %140 : vector<16x128xi32>
      %c-1_i32 = arith.constant -1 : i32
      %142 = vector.broadcast %c-1_i32 : i32 to vector<16x128xi32>
      %143 = arith.select %141, %142, %138 : vector<16x128xi1>, vector<16x128xi32>
      %c15_i32 = arith.constant 15 : i32
      %144 = tpu.dynamic_rotate %2 by %c15_i32 dim 0 : vector<16x128xi32>, i32 -> vector<16x128xi32>
      %145 = tpu.iota {dimensions = array<i32: 0>} : vector<16x128xi32>
      %c15_i32_60 = arith.constant 15 : i32
      %146 = vector.broadcast %c15_i32_60 : i32 to vector<16x128xi32>
      %147 = arith.cmpi eq, %145, %146 : vector<16x128xi32>
      %c-1_i32_61 = arith.constant -1 : i32
      %148 = vector.broadcast %c-1_i32_61 : i32 to vector<16x128xi32>
      %149 = arith.select %147, %148, %144 : vector<16x128xi1>, vector<16x128xi32>
      %c1_i32_62 = arith.constant 1 : i32
      %150 = tpu.dynamic_rotate %2 by %c1_i32_62 dim 1 : vector<16x128xi32>, i32 -> vector<16x128xi32>
      %151 = tpu.iota {dimensions = array<i32: 1>} : vector<16x128xi32>
      %c0_i32_63 = arith.constant 0 : i32
      %152 = vector.broadcast %c0_i32_63 : i32 to vector<16x128xi32>
      %153 = arith.cmpi eq, %151, %152 : vector<16x128xi32>
      %c-1_i32_64 = arith.constant -1 : i32
      %154 = vector.broadcast %c-1_i32_64 : i32 to vector<16x128xi32>
      %155 = arith.select %153, %154, %150 : vector<16x128xi1>, vector<16x128xi32>
      %c127_i32 = arith.constant 127 : i32
      %156 = tpu.dynamic_rotate %2 by %c127_i32 dim 1 : vector<16x128xi32>, i32 -> vector<16x128xi32>
      %157 = tpu.iota {dimensions = array<i32: 1>} : vector<16x128xi32>
      %c127_i32_65 = arith.constant 127 : i32
      %158 = vector.broadcast %c127_i32_65 : i32 to vector<16x128xi32>
      %159 = arith.cmpi eq, %157, %158 : vector<16x128xi32>
      %c-1_i32_66 = arith.constant -1 : i32
      %160 = vector.broadcast %c-1_i32_66 : i32 to vector<16x128xi32>
      %161 = arith.select %159, %160, %156 : vector<16x128xi1>, vector<16x128xi32>
      %162 = arith.cmpi eq, %143, %2 : vector<16x128xi32>
      %163 = arith.cmpi eq, %149, %2 : vector<16x128xi32>
      %164 = arith.andi %162, %163 : vector<16x128xi1>
      %165 = arith.cmpi eq, %155, %2 : vector<16x128xi32>
      %166 = arith.andi %164, %165 : vector<16x128xi1>
      %167 = arith.cmpi eq, %161, %2 : vector<16x128xi32>
      %168 = arith.andi %166, %167 : vector<16x128xi1>
      %c-1_i32_67 = arith.constant -1 : i32
      %169 = vector.broadcast %c-1_i32_67 : i32 to vector<16x128xi32>
      %170 = arith.select %168, %2, %169 : vector<16x128xi1>, vector<16x128xi32>
      %c0_68 = arith.constant 0 : index
      %c0_69 = arith.constant 0 : index
      %171 = vector.load %arg8[%c0_68, %c0_69] : memref<16x128xi32, #tpu.memory_space<vmem>>, vector<16x128xi32>
      tpu.vector_store %arg8[%c0_68, %c0_69], %170 {strides = array<i32>} : memref<16x128xi32, #tpu.memory_space<vmem>>, vector<16x128xi32>,
      %c0_i32_70 = arith.constant 0 : i32
      %172 = vector.broadcast %c0_i32_70 : i32 to vector<16x128xi32>
      %173 = arith.cmpi sge, %2, %172 : vector<16x128xi32>
      %c32_i32_71 = arith.constant 32 : i32
      %174 = vector.broadcast %c32_i32_71 : i32 to vector<16x128xi32>
      %175 = arith.cmpi slt, %2, %174 : vector<16x128xi32>
      %176 = arith.andi %173, %175 : vector<16x128xi1>
      %c0_i32_72 = arith.constant 0 : i32
      %177 = vector.broadcast %c0_i32_72 : i32 to vector<16x128xi32>
      %178 = arith.subi %2, %177 : vector<16x128xi32>
      %c0_i32_73 = arith.constant 0 : i32
      %179 = vector.broadcast %c0_i32_73 : i32 to vector<16x128xi32>
      %180 = arith.select %176, %178, %179 : vector<16x128xi1>, vector<16x128xi32>
      %c1_i32_74 = arith.constant 1 : i32
      %181 = vector.broadcast %c1_i32_74 : i32 to vector<16x128xi32>
      %182 = arith.shli %181, %180 : vector<16x128xi32>
      %c0_i32_75 = arith.constant 0 : i32
      %183 = vector.broadcast %c0_i32_75 : i32 to vector<16x128xi32>
      %184 = arith.select %176, %182, %183 : vector<16x128xi1>, vector<16x128xi32>
      %c0_i32_76 = arith.constant 0 : i32
      %185 = vector.broadcast %c0_i32_76 : i32 to vector<16x128xi32>
      %186 = arith.cmpi sge, %143, %185 : vector<16x128xi32>
      %c32_i32_77 = arith.constant 32 : i32
      %187 = vector.broadcast %c32_i32_77 : i32 to vector<16x128xi32>
      %188 = arith.cmpi slt, %143, %187 : vector<16x128xi32>
      %189 = arith.andi %186, %188 : vector<16x128xi1>
      %c0_i32_78 = arith.constant 0 : i32
      %190 = vector.broadcast %c0_i32_78 : i32 to vector<16x128xi32>
      %191 = arith.subi %143, %190 : vector<16x128xi32>
      %c0_i32_79 = arith.constant 0 : i32
      %192 = vector.broadcast %c0_i32_79 : i32 to vector<16x128xi32>
      %193 = arith.select %189, %191, %192 : vector<16x128xi1>, vector<16x128xi32>
      %c1_i32_80 = arith.constant 1 : i32
      %194 = vector.broadcast %c1_i32_80 : i32 to vector<16x128xi32>
      %195 = arith.shli %194, %193 : vector<16x128xi32>
      %c0_i32_81 = arith.constant 0 : i32
      %196 = vector.broadcast %c0_i32_81 : i32 to vector<16x128xi32>
      %197 = arith.select %189, %195, %196 : vector<16x128xi1>, vector<16x128xi32>
      %198 = arith.ori %184, %197 : vector<16x128xi32>
      %c0_i32_82 = arith.constant 0 : i32
      %199 = vector.broadcast %c0_i32_82 : i32 to vector<16x128xi32>
      %200 = arith.cmpi sge, %149, %199 : vector<16x128xi32>
      %c32_i32_83 = arith.constant 32 : i32
      %201 = vector.broadcast %c32_i32_83 : i32 to vector<16x128xi32>
      %202 = arith.cmpi slt, %149, %201 : vector<16x128xi32>
      %203 = arith.andi %200, %202 : vector<16x128xi1>
      %c0_i32_84 = arith.constant 0 : i32
      %204 = vector.broadcast %c0_i32_84 : i32 to vector<16x128xi32>
      %205 = arith.subi %149, %204 : vector<16x128xi32>
      %c0_i32_85 = arith.constant 0 : i32
      %206 = vector.broadcast %c0_i32_85 : i32 to vector<16x128xi32>
      %207 = arith.select %203, %205, %206 : vector<16x128xi1>, vector<16x128xi32>
      %c1_i32_86 = arith.constant 1 : i32
      %208 = vector.broadcast %c1_i32_86 : i32 to vector<16x128xi32>
      %209 = arith.shli %208, %207 : vector<16x128xi32>
      %c0_i32_87 = arith.constant 0 : i32
      %210 = vector.broadcast %c0_i32_87 : i32 to vector<16x128xi32>
      %211 = arith.select %203, %209, %210 : vector<16x128xi1>, vector<16x128xi32>
      %212 = arith.ori %198, %211 : vector<16x128xi32>
      %c0_i32_88 = arith.constant 0 : i32
      %213 = vector.broadcast %c0_i32_88 : i32 to vector<16x128xi32>
      %214 = arith.cmpi sge, %155, %213 : vector<16x128xi32>
      %c32_i32_89 = arith.constant 32 : i32
      %215 = vector.broadcast %c32_i32_89 : i32 to vector<16x128xi32>
      %216 = arith.cmpi slt, %155, %215 : vector<16x128xi32>
      %217 = arith.andi %214, %216 : vector<16x128xi1>
      %c0_i32_90 = arith.constant 0 : i32
      %218 = vector.broadcast %c0_i32_90 : i32 to vector<16x128xi32>
      %219 = arith.subi %155, %218 : vector<16x128xi32>
      %c0_i32_91 = arith.constant 0 : i32
      %220 = vector.broadcast %c0_i32_91 : i32 to vector<16x128xi32>
      %221 = arith.select %217, %219, %220 : vector<16x128xi1>, vector<16x128xi32>
      %c1_i32_92 = arith.constant 1 : i32
      %222 = vector.broadcast %c1_i32_92 : i32 to vector<16x128xi32>
      %223 = arith.shli %222, %221 : vector<16x128xi32>
      %c0_i32_93 = arith.constant 0 : i32
      %224 = vector.broadcast %c0_i32_93 : i32 to vector<16x128xi32>
      %225 = arith.select %217, %223, %224 : vector<16x128xi1>, vector<16x128xi32>
      %226 = arith.ori %212, %225 : vector<16x128xi32>
      %c0_i32_94 = arith.constant 0 : i32
      %227 = vector.broadcast %c0_i32_94 : i32 to vector<16x128xi32>
      %228 = arith.cmpi sge, %161, %227 : vector<16x128xi32>
      %c32_i32_95 = arith.constant 32 : i32
      %229 = vector.broadcast %c32_i32_95 : i32 to vector<16x128xi32>
      %230 = arith.cmpi slt, %161, %229 : vector<16x128xi32>
      %231 = arith.andi %228, %230 : vector<16x128xi1>
      %c0_i32_96 = arith.constant 0 : i32
      %232 = vector.broadcast %c0_i32_96 : i32 to vector<16x128xi32>
      %233 = arith.subi %161, %232 : vector<16x128xi32>
      %c0_i32_97 = arith.constant 0 : i32
      %234 = vector.broadcast %c0_i32_97 : i32 to vector<16x128xi32>
      %235 = arith.select %231, %233, %234 : vector<16x128xi1>, vector<16x128xi32>
      %c1_i32_98 = arith.constant 1 : i32
      %236 = vector.broadcast %c1_i32_98 : i32 to vector<16x128xi32>
      %237 = arith.shli %236, %235 : vector<16x128xi32>
      %c0_i32_99 = arith.constant 0 : i32
      %238 = vector.broadcast %c0_i32_99 : i32 to vector<16x128xi32>
      %239 = arith.select %231, %237, %238 : vector<16x128xi1>, vector<16x128xi32>
      %240 = arith.ori %226, %239 : vector<16x128xi32>
      %c0_100 = arith.constant 0 : index
      %c0_101 = arith.constant 0 : index
      %c0_102 = arith.constant 0 : index
      %241 = vector.load %arg7[%c0_100, %c0_101, %c0_102] : memref<1x16x128xi32, #tpu.memory_space<vmem>>, vector<1x16x128xi32>
      %242 = vector.shape_cast %241 : vector<1x16x128xi32> to vector<16x128xi32>
      %243 = vector.shape_cast %240 : vector<16x128xi32> to vector<1x16x128xi32>
      tpu.vector_store %arg7[%c0_100, %c0_101, %c0_102], %243 {strides = array<i32>} : memref<1x16x128xi32, #tpu.memory_space<vmem>>, vector<1x16x128xi32>,
    } else {
    }
    %c0_4 = arith.constant 0 : index
    %c0_5 = arith.constant 0 : index
    %c0_6 = arith.constant 0 : index
    %c0_7 = arith.constant 0 : index
    %6 = vector.load %arg3[%c0_4, %c0_5, %c0_6, %c0_7] : memref<1x1x16x128xf32, #tpu.memory_space<vmem>>, vector<1x1x16x128xf32>
    %7 = vector.shape_cast %6 : vector<1x1x16x128xf32> to vector<16x128xf32>
    %cst = arith.constant 1.000000e+00 : f32
    %8 = vector.broadcast %cst : f32 to vector<16x128xf32>
    %9 = arith.mulf %7, %8 : vector<16x128xf32>
    %c0_8 = arith.constant 0 : index
    %c0_9 = arith.constant 0 : index
    %c0_10 = arith.constant 0 : index
    %c0_11 = arith.constant 0 : index
    %10 = vector.load %arg4[%c0_8, %c0_9, %c0_10, %c0_11] : memref<1x1x16x128xf32, #tpu.memory_space<vmem>>, vector<1x1x16x128xf32>
    %11 = vector.shape_cast %10 : vector<1x1x16x128xf32> to vector<16x128xf32>
    %cst_12 = arith.constant 1.000000e+00 : f32
    %12 = vector.broadcast %cst_12 : f32 to vector<16x128xf32>
    %13 = arith.mulf %11, %12 : vector<16x128xf32>
    %14 = vector.shape_cast %13 : vector<16x128xf32> to vector<1x16x128xf32>
    %cst_13 = arith.constant dense<0xFF800000> : vector<1xf32>
    %15 = vector.multi_reduction <maximumf>, %14, %cst_13 [1, 2] : vector<1x16x128xf32> to vector<1xf32>
    %16 = vector.shape_cast %15 : vector<1xf32> to vector<1x1x1xf32>
    %17 = vector.extract %16[0, 0, 0] : f32 from vector<1x1x1xf32>
    %18 = vector.broadcast %17 : f32 to vector<1x1xf32>
    %cst_14 = arith.constant 0.000000e+00 : f32
    %19 = vector.broadcast %cst_14 : f32 to vector<1x1xf32>
    %20 = arith.maximumf %18, %19 : vector<1x1xf32>
    %21 = vector.shape_cast %9 : vector<16x128xf32> to vector<1x16x128xf32>
    %cst_15 = arith.constant dense<0xFF800000> : vector<1xf32>
    %22 = vector.multi_reduction <maximumf>, %21, %cst_15 [1, 2] : vector<1x16x128xf32> to vector<1xf32>
    %23 = vector.shape_cast %22 : vector<1xf32> to vector<1x1x1xf32>
    %24 = vector.extract %23[0, 0, 0] : f32 from vector<1x1x1xf32>
    %25 = vector.broadcast %24 : f32 to vector<1x1xf32>
    %cst_16 = arith.constant 0.000000e+00 : f32
    %26 = vector.broadcast %cst_16 : f32 to vector<1x1xf32>
    %27 = arith.maximumf %25, %26 : vector<1x1xf32>
    %28 = vector.broadcast %20 : vector<1x1xf32> to vector<16x128xf32>
    %29 = arith.subf %13, %28 : vector<16x128xf32>
    %30 = vector.broadcast %27 : vector<1x1xf32> to vector<16x128xf32>
    %31 = arith.subf %9, %30 : vector<16x128xf32>
    %32 = math.exp %29 : vector<16x128xf32>
    %33 = math.exp %31 : vector<16x128xf32>
    %34 = arith.subf %29, %31 : vector<16x128xf32>
    %35 = arith.mulf %32, %34 : vector<16x128xf32>
    %cst_17 = arith.constant 0.000000e+00 : f32
    %36 = vector.broadcast %cst_17 : f32 to vector<1x1xf32>
    %37 = arith.subf %36, %20 : vector<1x1xf32>
    %38 = math.exp %37 : vector<1x1xf32>
    %cst_18 = arith.constant 0.000000e+00 : f32
    %39 = vector.broadcast %cst_18 : f32 to vector<1x1xf32>
    %40 = arith.subf %39, %27 : vector<1x1xf32>
    %41 = math.exp %40 : vector<1x1xf32>
    %42 = arith.subf %27, %20 : vector<1x1xf32>
    %43 = arith.mulf %38, %42 : vector<1x1xf32>
    %c0_19 = arith.constant 0 : index
    %c0_20 = arith.constant 0 : index
    %44 = vector.load %arg8[%c0_19, %c0_20] : memref<16x128xi32, #tpu.memory_space<vmem>>, vector<16x128xi32>
    %45 = vector.broadcast %0 : i32 to vector<16x128xi32>
    %46 = arith.cmpi eq, %44, %45 : vector<16x128xi32>
    %c0_21 = arith.constant 0 : index
    %c0_22 = arith.constant 0 : index
    %c0_23 = arith.constant 0 : index
    %47 = vector.load %arg7[%c0_21, %c0_22, %c0_23] : memref<1x16x128xi32, #tpu.memory_space<vmem>>, vector<1x16x128xi32>
    %48 = vector.shape_cast %47 : vector<1x16x128xi32> to vector<16x128xi32>
    %c32_i32 = arith.constant 32 : i32
    %c0_i32_24 = arith.constant 0 : i32
    %49 = arith.cmpi eq, %c32_i32, %c0_i32_24 : i32
    %c1_i32_25 = arith.constant 1 : i32
    %50 = arith.select %49, %c1_i32_25, %c32_i32 : i32
    %51 = arith.remsi %0, %50 : i32
    %c0_i32_26 = arith.constant 0 : i32
    %52 = arith.cmpi ne, %51, %c0_i32_26 : i32
    %c0_i32_27 = arith.constant 0 : i32
    %53 = arith.cmpi slt, %51, %c0_i32_27 : i32
    %c0_i32_28 = arith.constant 0 : i32
    %54 = arith.cmpi slt, %50, %c0_i32_28 : i32
    %55 = arith.xori %53, %54 : i1
    %56 = arith.andi %55, %52 : i1
    %57 = arith.addi %51, %50 : i32
    %58 = arith.select %56, %57, %51 : i32
    %c1_i32_29 = arith.constant 1 : i32
    %59 = arith.shli %c1_i32_29, %58 : i32
    %60 = vector.broadcast %59 : i32 to vector<16x128xi32>
    %61 = arith.andi %48, %60 : vector<16x128xi32>
    %c0_i32_30 = arith.constant 0 : i32
    %62 = vector.broadcast %c0_i32_30 : i32 to vector<16x128xi32>
    %63 = arith.cmpi ne, %61, %62 : vector<16x128xi32>
    %cst_31 = arith.constant dense<true> : vector<16x128xi1>
    %64 = arith.xori %46, %cst_31 : vector<16x128xi1>
    %65 = arith.andi %63, %64 : vector<16x128xi1>
    %c0_32 = arith.constant 0 : index
    %c0_33 = arith.constant 0 : index
    %c0_34 = arith.constant 0 : index
    %66 = vector.load %arg5[%c0_32, %c0_33, %c0_34] : memref<1x8x128xf32, #tpu.memory_space<vmem>>, vector<1x8x128xf32>
    %67 = vector.shape_cast %38 : vector<1x1xf32> to vector<1x1xf32>
    %68 = vector.broadcast %67 : vector<1x1xf32> to vector<16x128xf32>
    %69 = arith.select %65, %32, %68 : vector<16x128xi1>, vector<16x128xf32>
    %70 = vector.shape_cast %69 : vector<16x128xf32> to vector<1x16x128xf32>
    %cst_35 = arith.constant dense<0.000000e+00> : vector<1xf32>
    %71 = vector.multi_reduction <add>, %70, %cst_35 [1, 2] : vector<1x16x128xf32> to vector<1xf32>
    %72 = vector.shape_cast %71 : vector<1xf32> to vector<1x1x1xf32>
    %73 = vector.extract %72[0, 0, 0] : f32 from vector<1x1x1xf32>
    %74 = vector.broadcast %73 : f32 to vector<1x1xf32>
    %75 = vector.shape_cast %41 : vector<1x1xf32> to vector<1x1xf32>
    %76 = vector.broadcast %75 : vector<1x1xf32> to vector<16x128xf32>
    %77 = arith.select %65, %33, %76 : vector<16x128xi1>, vector<16x128xf32>
    %78 = vector.shape_cast %77 : vector<16x128xf32> to vector<1x16x128xf32>
    %cst_36 = arith.constant dense<0.000000e+00> : vector<1xf32>
    %79 = vector.multi_reduction <add>, %78, %cst_36 [1, 2] : vector<1x16x128xf32> to vector<1xf32>
    %80 = vector.shape_cast %79 : vector<1xf32> to vector<1x1x1xf32>
    %81 = vector.extract %80[0, 0, 0] : f32 from vector<1x1x1xf32>
    %82 = vector.broadcast %81 : f32 to vector<1x1xf32>
    %83 = vector.shape_cast %43 : vector<1x1xf32> to vector<1x1xf32>
    %84 = vector.broadcast %83 : vector<1x1xf32> to vector<16x128xf32>
    %85 = arith.select %65, %35, %84 : vector<16x128xi1>, vector<16x128xf32>
    %86 = vector.shape_cast %85 : vector<16x128xf32> to vector<1x16x128xf32>
    %cst_37 = arith.constant dense<0.000000e+00> : vector<1xf32>
    %87 = vector.multi_reduction <add>, %86, %cst_37 [1, 2] : vector<1x16x128xf32> to vector<1xf32>
    %88 = vector.shape_cast %87 : vector<1xf32> to vector<1x1x1xf32>
    %89 = vector.extract %88[0, 0, 0] : f32 from vector<1x1x1xf32>
    %90 = vector.broadcast %89 : f32 to vector<1x1xf32>
    %91 = arith.divf %90, %74 : vector<1x1xf32>
    %92 = math.log %82 : vector<1x1xf32>
    %93 = math.log %74 : vector<1x1xf32>
    %94 = arith.subf %92, %93 : vector<1x1xf32>
    %95 = arith.addf %91, %94 : vector<1x1xf32>
    %96 = vector.shape_cast %95 : vector<1x1xf32> to vector<1x1x1xf32>
    %97 = vector.broadcast %96 : vector<1x1x1xf32> to vector<1x8x128xf32>
    %98 = arith.addf %66, %97 : vector<1x8x128xf32>
    %c0_38 = arith.constant 0 : index
    %c0_39 = arith.constant 0 : index
    %c0_40 = arith.constant 0 : index
    %99 = vector.load %arg5[%c0_38, %c0_39, %c0_40] : memref<1x8x128xf32, #tpu.memory_space<vmem>>, vector<1x8x128xf32>
    tpu.vector_store %arg5[%c0_38, %c0_39, %c0_40], %98 {strides = array<i32>} : memref<1x8x128xf32, #tpu.memory_space<vmem>>, vector<1x8x128xf32>,
    %c0_41 = arith.constant 0 : index
    %c0_42 = arith.constant 0 : index
    %c0_43 = arith.constant 0 : index
    %100 = vector.load %arg6[%c0_41, %c0_42, %c0_43] : memref<1x8x128xf32, #tpu.memory_space<vmem>>, vector<1x8x128xf32>
    %101 = vector.shape_cast %38 : vector<1x1xf32> to vector<1x1xf32>
    %102 = vector.broadcast %101 : vector<1x1xf32> to vector<16x128xf32>
    %103 = arith.select %46, %32, %102 : vector<16x128xi1>, vector<16x128xf32>
    %104 = vector.shape_cast %103 : vector<16x128xf32> to vector<1x16x128xf32>
    %cst_44 = arith.constant dense<0.000000e+00> : vector<1xf32>
    %105 = vector.multi_reduction <add>, %104, %cst_44 [1, 2] : vector<1x16x128xf32> to vector<1xf32>
    %106 = vector.shape_cast %105 : vector<1xf32> to vector<1x1x1xf32>
    %107 = vector.extract %106[0, 0, 0] : f32 from vector<1x1x1xf32>
    %108 = vector.broadcast %107 : f32 to vector<1x1xf32>
    %109 = vector.shape_cast %41 : vector<1x1xf32> to vector<1x1xf32>
    %110 = vector.broadcast %109 : vector<1x1xf32> to vector<16x128xf32>
    %111 = arith.select %46, %33, %110 : vector<16x128xi1>, vector<16x128xf32>
    %112 = vector.shape_cast %111 : vector<16x128xf32> to vector<1x16x128xf32>
    %cst_45 = arith.constant dense<0.000000e+00> : vector<1xf32>
    %113 = vector.multi_reduction <add>, %112, %cst_45 [1, 2] : vector<1x16x128xf32> to vector<1xf32>
    %114 = vector.shape_cast %113 : vector<1xf32> to vector<1x1x1xf32>
    %115 = vector.extract %114[0, 0, 0] : f32 from vector<1x1x1xf32>
    %116 = vector.broadcast %115 : f32 to vector<1x1xf32>
    %117 = vector.shape_cast %43 : vector<1x1xf32> to vector<1x1xf32>
    %118 = vector.broadcast %117 : vector<1x1xf32> to vector<16x128xf32>
    %119 = arith.select %46, %35, %118 : vector<16x128xi1>, vector<16x128xf32>
    %120 = vector.shape_cast %119 : vector<16x128xf32> to vector<1x16x128xf32>
    %cst_46 = arith.constant dense<0.000000e+00> : vector<1xf32>
    %121 = vector.multi_reduction <add>, %120, %cst_46 [1, 2] : vector<1x16x128xf32> to vector<1xf32>
    %122 = vector.shape_cast %121 : vector<1xf32> to vector<1x1x1xf32>
    %123 = vector.extract %122[0, 0, 0] : f32 from vector<1x1x1xf32>
    %124 = vector.broadcast %123 : f32 to vector<1x1xf32>
    %125 = arith.divf %124, %108 : vector<1x1xf32>
    %126 = math.log %116 : vector<1x1xf32>
    %127 = math.log %108 : vector<1x1xf32>
    %128 = arith.subf %126, %127 : vector<1x1xf32>
    %129 = arith.addf %125, %128 : vector<1x1xf32>
    %130 = vector.shape_cast %129 : vector<1x1xf32> to vector<1x1x1xf32>
    %131 = vector.broadcast %130 : vector<1x1x1xf32> to vector<1x8x128xf32>
    %132 = arith.addf %100, %131 : vector<1x8x128xf32>
    %c0_47 = arith.constant 0 : index
    %c0_48 = arith.constant 0 : index
    %c0_49 = arith.constant 0 : index
    %133 = vector.load %arg6[%c0_47, %c0_48, %c0_49] : memref<1x8x128xf32, #tpu.memory_space<vmem>>, vector<1x8x128xf32>
    tpu.vector_store %arg6[%c0_47, %c0_48, %c0_49], %132 {strides = array<i32>} : memref<1x8x128xf32, #tpu.memory_space<vmem>>, vector<1x8x128xf32>,
    return
  }
  func.func @transform_0(%arg0: i32, %arg1: i32) -> (i32, i32, i32, i32) {
    %c0_i32 = arith.constant 0 : i32
    %c0_i32_0 = arith.constant 0 : i32
    %c0_i32_1 = arith.constant 0 : i32
    %c0_i32_2 = arith.constant 0 : i32
    return %arg0, %c0_i32, %c0_i32_0, %c0_i32_1 : i32, i32, i32, i32
  }
  func.func @transform_1(%arg0: i32, %arg1: i32) -> (i32, i32, i32, i32) {
    %c1_i32 = arith.constant 1 : i32
    %0 = arith.addi %arg1, %c1_i32 : i32
    %c0_i32 = arith.constant 0 : i32
    %c0_i32_0 = arith.constant 0 : i32
    %c0_i32_1 = arith.constant 0 : i32
    return %arg0, %0, %c0_i32, %c0_i32_0 : i32, i32, i32, i32
  }
  func.func @transform_2(%arg0: i32, %arg1: i32) -> (i32, i32, i32, i32) {
    %c1_i32 = arith.constant 1 : i32
    %0 = arith.addi %arg1, %c1_i32 : i32
    %c0_i32 = arith.constant 0 : i32
    %c0_i32_0 = arith.constant 0 : i32
    %c0_i32_1 = arith.constant 0 : i32
    return %arg0, %0, %c0_i32, %c0_i32_0 : i32, i32, i32, i32
  }
  func.func @transform_3(%arg0: i32, %arg1: i32) -> (i32, i32, i32) {
    %c0_i32 = arith.constant 0 : i32
    %c0_i32_0 = arith.constant 0 : i32
    %c0_i32_1 = arith.constant 0 : i32
    return %arg0, %c0_i32, %c0_i32_0 : i32, i32, i32
  }
  func.func @transform_4(%arg0: i32, %arg1: i32) -> (i32, i32, i32) {
    %c0_i32 = arith.constant 0 : i32
    %c0_i32_0 = arith.constant 0 : i32
    %c0_i32_1 = arith.constant 0 : i32
    return %arg0, %c0_i32, %c0_i32_0 : i32, i32, i32
  }
}

</mosaic_0001>

<bundles_post_ra>
// kernel: tpu_custom_call.1
= control target key start
LH: loop header
LB: loop body
LE: loop exit
PB: predicated region body
PF: predicated region fallthrough
CT: control target
= control target key end

     0   :  { %s1931_s0 = inlined_call_operand.hbm [shape: s32[2,1,16,128], index: 0, kind: input, shape index: {}]   ;;  %s1932_s1 = inlined_call_operand.hbm [shape: f32[2,4,16,128], index: 1, kind: input, shape index: {}]   ;;  %s1933_s2 = inlined_call_operand.hbm [shape: f32[2,4,16,128], index: 2, kind: input, shape index: {}]   ;;  %s1934_s3 = inlined_call_operand.hbm [shape: f32[2,8,128], index: 3, kind: output, shape index: {0}]   ;;  %s1935_s4 = inlined_call_operand.hbm [shape: f32[2,8,128], index: 4, kind: output, shape index: {1}]  }
   0x1   :  { %1956 = sst [smem:[#allocation25_spill]] %s1932_s1 }
   0x2   :  { %1957 = sst [smem:[#allocation26_spill]] %s1935_s4 }
   0x3   :  { %10 = vsyncpa [#allocation5], 0 }
   0x4   :  { %12 = vsyncpa [#allocation5 + $0x1], 0 }
   0x5   :  { %13 = vsyncpa [#allocation8], 0 }
   0x6   :  { %15 = vsyncpa [#allocation8 + $0x1], 0 }
   0x7   :  { %16 = vsyncpa [#allocation6], 0 }
   0x8   :  { %18 = vsyncpa [#allocation6 + $0x1], 0 }
   0x9   :  { %19 = vsyncpa [#allocation12], 0 }
   0xa   :  { %21 = vsyncpa [#allocation12 + $0x1], 0  ;;  %s1330_s15 = smov 0   ;;  %s1332_s16 = smov 0  }
   0xb   :  { %s1334_s17 = smov 0   ;;  %s1336_s18 = smov 0  }
   0xc   :  { %s1338_s19 = smov 0   ;;  %s1340_s20 = smov 0  }
   0xd   :  { %s1342_s21 = smov 0   ;;  %s1344_s22 = smov 0  }
   0xe   :  { %s1346_s23 = smov 0   ;;  %s1348_s24 = smov 0  }
   0xf   :  { %s1350_s25 = smov 0  }
  0x10 LB: > { %1958 = sst [smem:[#allocation17_spill]] %s1258_s17  ;;  %s1384_s26 = sadd.s32 4294967295, %s1290_s25   ;;  %s1290_s25 = sphi %s1350_s25, %s27_s25   ;;  %s1286_s24 = sphi %s1348_s24, %s2033_s24   ;;  %s1282_s23 = sphi %s1346_s23, %s2025_s23   ;;  %s1278_s22 = sphi %s1344_s22, %s2032_s22   ;;  %s1274_s21 = sphi %s1342_s21, %s2024_s21   ;;  %s1270_s20 = sphi %s1340_s20, %s2031_s20   ;;  %s1266_s19 = sphi %s1338_s19, %s2030_s19   ;;  %s1262_s18 = sphi %s1336_s18, %s2029_s18   ;;  %s1258_s17 = sphi %s1334_s17, %s2022_s17   ;;  %s1254_s16 = sphi %s1332_s16, %s2028_s16   ;;  %s1250_s15 = sphi %s1330_s15, %s2027_s15  }
  0x11   : > { %1959 = sst [smem:[#allocation18_spill]] %s1262_s18  ;;  %s36_s27 = sadd.s32 1, %s1282_s23 }
  0x12   : > { %1960 = sst [smem:[#allocation19_spill]] %s1282_s23  ;;  %p37_p0 = scmp.ge.s32.totalorder %s36_s27, 3 }
  0x13   : > { %s39_s28 = sadd.s32 1, %s1286_s24  ;;  %p1942_p1 = scmp.eq.s32.totalorder %s1290_s25, 0 }
  0x14   : > { %p1941_p2 = scmp.eq.s32.totalorder %s1384_s26, 0  ;;  %s2035_s28 = smov (!%p37_p0, %s39_s28), %s1286_s24 }
  0x15   : > { %s1390_s29 = scalar_select %p37_p0, 0, %s36_s27  }
  0x16   : > { %s76_s5 = sadd.s32 1, %s1258_s17  ;;  %p41_p3 = scmp.ge.s32.totalorder %s2035_s28, 2 }
  0x17   : > { %1961 = sst [smem:[#allocation20_spill]] %s1390_s29  ;;  %s70_s30 = sadd.s32 1, %s1390_s29 }
  0x18   : > { %s72_s6 = ssub.s32 %s36_s27, %s70_s30  ;;  %p83_p4 = scmp.ne.s32.totalorder %s1258_s17, %s1254_s16 }
  0x19   : > { %p89_p5 = scmp.ne.s32.totalorder %s1254_s16, %s1250_s15  ;;  %s2037_s28 = smov (%p41_p3, %s2035_s28), 0 }
  0x1a   : > { %1962 = sst [smem:[#allocation21_spill]] %s2037_s28  ;;  %p1402_p6 = por %p83_p4, %p1942_p1 }
  0x1b   : > { %p1408_p7 = por %p89_p5, %p1941_p2  ;;  %s1414_s9 = ssub.s32 %s1286_s24, %s2037_s28 }
  0x1c   : > { %s73_s10 = sor.u32 %s72_s6, %s1414_s9  ;;  %p1940_p10 = scmp.lt.s32.totalorder %s1290_s25, 6 }
  0x1d   : > { %s1964_s8 = scalar_select %p1408_p7, 1, 0 }
  0x1e   : > { %p74_p9 = scmp.eq.s32.totalorder %s73_s10, 0  ;;  %s216_s12 = sand.u32 1, %s1290_s25  }
  0x1f   : > { %s218_s13 = sand.u32 1, %s1258_s17   ;;  %s851_s15 = sshll.u32 %s1282_s23, 1 }
  0x20   : > { %s1420_s11 = scalar_select %p74_p9, %s1258_s17, %s76_s5  }
  0x21   : > { %s1424_s14 = sshll.u32 %s218_s13, 4  ;;  %s852_s27 = sshll.u32 %s1286_s24, 3 }
  0x22   : > { %1965 = sst [smem:[#allocation22_spill]] %s1420_s11  ;;  %s220_s30 = scalar_lea.vmem [#allocation7], %s1424_s14 }
  0x23   : > { %s230_s28 = sshll.u32 %s220_s30, 4  ;;  %s1429_s29 = sadd.s32 %s852_s27, %s851_s15  ;;  %s1431_s28 = int_to_ptr.vmem [resolvable:$true] %s230_s28 }
  0x24   : > { %s1939_s6 = sshll.u32 %s1429_s29, 7  ;;  %p1438_p11 = pnand %p1940_p10, %p1402_p6 }
  0x25   : > { %s1967_s1 = sld [smem:[#allocation25_spill]]  ;;  %s1449_s27 = scalar_lea.sflag [#allocation8], %s216_s12 }
  0x26   : > { %p1042_p13 = pneg %p1438_p11 }
  0x2b   : > { %s730_s30 = scalar_lea.hbm %s1967_s1, %s1939_s6  ;;  %s1045_s13 = scalar_lea.hbm %s1967_s1, 2048 }
  0x2c   : > { %s1447_s15 = scalar_lea.hbm %s730_s30, 256  ;;  %s1070_s7 = scalar_lea.hbm %s730_s30, 512 }
  0x2d   : > { %p1041_p12 = scmp.ne.s32.totalorder %s1447_s15, %s1070_s7  ;;  %p1046_p4 = scmp.lt.u32.totalorder %s1447_s15, %s1967_s1 }
  0x2e   : > { %p1047_p5 = scmp.lt.u32.totalorder %s1045_s13, %s1070_s7  ;;  %p1049_p9 = scmp.lt.u32.totalorder %s1070_s7, %s1447_s15 }
  0x2f   : > { %p1043_p0 = pnand %p1042_p13, %p1041_p12 }
  0x30   : > { %p1048_p6 = por %p1047_p5, %p1046_p4 }
  0x31   : > { %p1044_p3 = pneg %p1043_p0 }
  0x32   : > { %p1050_p10 = por %p1049_p9, %p1048_p6 }
  0x34   : > { %p1051_p2 = pnand %p1050_p10, %p1044_p3 }
  0x36   : > { %1054 = shalt.err (!%p1051_p2)
}
  0x37   : > { %s1055_s12 = scalar_lea.vmem %s1431_s28, 256  ;;  %s1292_s23 = smov [#allocation7]  }
  0x38   : > { %p1056_p12 = scmp.ne.s32.totalorder %s1431_s28, %s1055_s12  ;;  %s1060_s30 = sshll.u32 %s1292_s23, 4  ;;  %s1061_s30 = int_to_ptr.vmem [resolvable:$false] %s1060_s30 }
  0x39   : > { %s1062_s11 = scalar_lea.vmem %s1061_s30, 512  ;;  %p1063_p8 = scmp.lt.s32.totalorder %s1431_s28, %s1061_s30 }
  0x3a   : > { %p1058_p0 = pnand %p1056_p12, %p1042_p13  ;;  %p1064_p4 = scmp.lt.s32.totalorder %s1062_s11, %s1055_s12 }
  0x3c   : > { %p1059_p1 = pneg %p1058_p0  ;;  %p1065_p5 = por %p1064_p4, %p1063_p8 }
  0x3e   : > { %p1066_p6 = pnand %p1065_p5, %p1059_p1 }
  0x40   : > { %1069 = shalt.err (!%p1066_p6)
}
  0x41   : > { %s1944_s6 = smov 128   ;;  %s1946_s7 = smov 8  }
  0x42   : > { %907 = dma.hbm_to_vmem [thread:$0]  (!%p1438_p11), %s1447_s15, 256, %s1431_s28, %s1449_s27, %s1944_s6, %s1944_s6, %s1946_s7  }
  0x43   : > { %s1968_s10 = sshll.u32 %s1429_s29, 7  ;;  %s244_s30 = scalar_lea.vmem [#allocation9], %s1424_s14 }
  0x44   : > { %s739_s23 = scalar_lea.hbm %s1933_s2, %s1968_s10  ;;  %s254_s11 = sshll.u32 %s244_s30, 4  ;;  %s1487_s11 = int_to_ptr.vmem [resolvable:$true] %s254_s11 }
  0x45   : > { %s1485_s1 = scalar_lea.hbm %s739_s23, 256  ;;  %p858_p1 = scmp.ge.s32.totalorder %s1290_s25, 1 }
  0x46   : > { %p262_p2 = scmp.lt.s32.totalorder %s1290_s25, 7  ;;  %s844_s28 = sadd.s32 4294967294, %s1290_s25  }
  0x47   : > { %s46_s29 = sadd.s32 1, %s1270_s20  ;;  %p53_p10 = scmp.ne.s32.totalorder %s1270_s20, %s1266_s19 }
  0x48   : > { %p1491_p8 = pnand %p858_p1, %p262_p2  ;;  %p1970_p3 = scmp.eq.s32.totalorder %s1414_s9, 0 }
  0x49   : > { %p1972_p9 = scmp.eq.s32.totalorder %s1290_s25, 0  ;;  %p59_p0 = scmp.ne.s32.totalorder %s1266_s19, %s1262_s18 }
  0x4a   : > { %s1969_s17 = scalar_select %p1491_p8, 1, 0 }
  0x4b   : > { %s1502_s14 = scalar_select %p1970_p3, %s1270_s20, %s46_s29  }
  0x4c   : > { %p1506_p12 = por %p1972_p9, %p53_p10  ;;  %p143_p4 = scmp.eq.s32.totalorder %s1384_s26, 5 }
  0x4d   : > { %1971 = sst [smem:[#allocation23_spill]] %s1502_s14  ;;  %p149_p5 = scmp.eq.s32.totalorder %s844_s28, 5 }
  0x4e   : > { %p1974_p6 = scmp.eq.s32.totalorder %s1384_s26, 0  ;;  %s1951_s9 = sand.u32 1, %s1270_s20  }
  0x4f   : > { %p1520_p2 = por %p143_p4, %p53_p10  ;;  %p1524_p3 = por %p149_p5, %p59_p0 }
  0x50   : > { %p1515_p1 = por %p1974_p6, %p59_p0  ;;  %s847_s30 = sshll.u32 %s1951_s9, 4 }
  0x51   : > { %s1976_s13 = scalar_select %p1520_p2, 1, 0 }
  0x52   : > { %s1975_s10 = scalar_select %p1515_p1, 1, 0 }
  0x53   : > { %s1977_s12 = scalar_select %p1524_p3, 1, 0 }
  0x54   : > { %s874_s29 = sshll.u32 %s1286_s24, 8  ;;  %s199_s14 = scalar_lea.vmem [#allocation4], %s847_s30 }
  0x55   : > { %1978 = sst [smem:[#allocation24_spill]] %s1977_s12  ;;  %s1534_s7 = scalar_lea.hbm %s1931_s0, %s874_s29 }
  0x56   : > { %s206_s18 = sshll.u32 %s199_s14, 4  ;;  %p1979_p10 = scmp.lt.s32.totalorder %s1290_s25, 6  ;;  %s1536_s18 = int_to_ptr.vmem [resolvable:$true] %s206_s18 }
  0x57   : > { %s1101_s12 = scalar_lea.hbm %s739_s23, 512  ;;  %s1076_s29 = scalar_lea.hbm %s1933_s2, 2048 }
  0x58   : > { %p1542_p9 = pnand %p1979_p10, %p1506_p12  ;;  %p1072_p0 = scmp.ne.s32.totalorder %s1485_s1, %s1101_s12 }
  0x59   : > { %p1077_p6 = scmp.lt.u32.totalorder %s1485_s1, %s1933_s2  ;;  %p1078_p3 = scmp.lt.u32.totalorder %s1076_s29, %s1101_s12 }
  0x5a   : > { %p1074_p4 = pnand %p1072_p0, %p1042_p13  ;;  %p1080_p12 = scmp.lt.u32.totalorder %s1101_s12, %s1485_s1 }
  0x5b   : > { %p1079_p2 = por %p1078_p3, %p1077_p6 }
  0x5c   : > { %p1075_p5 = pneg %p1074_p4 }
  0x5d   : > { %p1081_p10 = por %p1080_p12, %p1079_p2 }
  0x5f   : > { %p1082_p7 = pnand %p1081_p10, %p1075_p5 }
  0x61   : > { %1085 = shalt.err (!%p1082_p7)
}
  0x62   : > { %s1086_s23 = scalar_lea.vmem %s1487_s11, 256  ;;  %s1295_s15 = smov [#allocation9]  }
  0x63   : > { %p1087_p0 = scmp.ne.s32.totalorder %s1487_s11, %s1086_s23  ;;  %s1091_s9 = sshll.u32 %s1295_s15, 4  ;;  %s1092_s9 = int_to_ptr.vmem [resolvable:$false] %s1091_s9 }
  0x64   : > { %s1093_s28 = scalar_lea.vmem %s1092_s9, 512  ;;  %p1094_p8 = scmp.lt.s32.totalorder %s1487_s11, %s1092_s9 }
  0x65   : > { %p1089_p4 = pnand %p1087_p0, %p1042_p13  ;;  %p1095_p3 = scmp.lt.s32.totalorder %s1093_s28, %s1086_s23 }
  0x67   : > { %p1090_p1 = pneg %p1089_p4  ;;  %p1096_p6 = por %p1095_p3, %p1094_p8 }
  0x69   : > { %p1097_p2 = pnand %p1096_p6, %p1090_p1 }
  0x6b   : > { %1100 = shalt.err (!%p1097_p2)
}
  0x6c   : > { %s1981_s12 = smov 8   ;;  %s1982_s6 = smov 128  }
  0x6d   : > { %910 = dma.hbm_to_vmem [thread:$0]  (!%p1438_p11), %s1485_s1, 256, %s1487_s11, %s1449_s27, %s1982_s6, %s1982_s6, %s1981_s12  }
  0x6e   : > { %s1983_s29 = sand.u32 1, %s1270_s20   ;;  %s1102_s14 = scalar_lea.hbm %s1534_s7, 256 }
  0x6f   : > { %s1574_s30 = scalar_lea.sflag [#allocation5], %s1983_s29  ;;  %p1103_p7 = scmp.ne.s32.totalorder %s1534_s7, %s1102_s14 }
  0x70   : > { %p1104_p13 = pneg %p1542_p9  ;;  %s1107_s15 = scalar_lea.hbm %s1931_s0, 512 }
  0x71   : > { %p1108_p5 = scmp.lt.u32.totalorder %s1534_s7, %s1931_s0  ;;  %p1109_p11 = scmp.lt.u32.totalorder %s1107_s15, %s1102_s14 }
  0x72   : > { %p1105_p8 = pnand %p1104_p13, %p1103_p7  ;;  %p1111_p10 = scmp.lt.u32.totalorder %s1102_s14, %s1534_s7 }
  0x73   : > { %p1110_p12 = por %p1109_p11, %p1108_p5 }
  0x74   : > { %p1106_p1 = pneg %p1105_p8 }
  0x75   : > { %p1112_p0 = por %p1111_p10, %p1110_p12 }
  0x77   : > { %p1113_p4 = pnand %p1112_p0, %p1106_p1 }
  0x79   : > { %1116 = shalt.err (!%p1113_p4)
}
  0x7a   : > { %s1117_s1 = scalar_lea.vmem %s1536_s18, 256  ;;  %s1296_s27 = smov [#allocation4]  }
  0x7b   : > { %p1118_p3 = scmp.ne.s32.totalorder %s1536_s18, %s1117_s1  ;;  %s1122_s11 = sshll.u32 %s1296_s27, 4  ;;  %s1123_s11 = int_to_ptr.vmem [resolvable:$false] %s1122_s11 }
  0x7c   : > { %s1124_s29 = scalar_lea.vmem %s1123_s11, 512  ;;  %p1125_p7 = scmp.lt.s32.totalorder %s1536_s18, %s1123_s11 }
  0x7d   : > { %p1120_p6 = pnand %p1118_p3, %p1104_p13  ;;  %p1126_p8 = scmp.lt.s32.totalorder %s1124_s29, %s1117_s1 }
  0x7f   : > { %p1121_p2 = pneg %p1120_p6  ;;  %p1127_p5 = por %p1126_p8, %p1125_p7 }
  0x81   : > { %p1128_p11 = pnand %p1127_p5, %p1121_p2 }
  0x83   : > { %1131 = shalt.err (!%p1128_p11)
}
  0x84   : > { %904 = dma.hbm_to_vmem [thread:$0]  (!%p1542_p9), %s1534_s7, 256, %s1536_s18, %s1574_s30, %s1982_s6, %s1982_s6, %s1981_s12  }
  0x85   : > { %p1984_p13 = scmp.ne.s32.totalorder %s1969_s17, 0 }
  0x86   : > { %s1608_s14 = sand.u32 (!%p1984_p13), 1, %s1266_s19   ;;  %p1985_p1 = scmp.ne.s32.totalorder (!%p1984_p13), %s1975_s10, 0 }
  0x87   : > { %266 = sbr.rel (%p1984_p13) target bundleno = 783 (0x30f), region = 32  ;;  %s859_s5 = sshll.u32 (!%p1984_p13), %s1608_s14, 4 }
  0x88   : > { %s269_s23 = scalar_lea.sflag (!%p1984_p13), [#allocation5], %s1608_s14  ;;  %s272_s15 = scalar_lea.vmem (!%p1984_p13), [#allocation4], %s859_s5 }
  0x8e   : > { %1233 = dma.done.wait (%p1985_p1), %s269_s23, 256  }
  0x8f   : > { %1235 = vsyncadd (%p1985_p1), %s269_s23, 4294967040  ;;  %s277_s4 = sand.u32 1, %s1384_s26   ;;  %s279_s17 = sand.u32 1, %s1254_s16  }
  0x90   : > { %s1618_s18 = sshll.u32 %s279_s17, 4  ;;  %s278_s7 = scalar_lea.sflag [#allocation8], %s277_s4 }
  0x91   : > { %s281_s12 = scalar_lea.vmem [#allocation7], %s1618_s18  ;;  %p1986_p9 = scmp.ne.s32.totalorder %s1964_s8, 0 }
  0x93   : > { %1237 = dma.done.wait (%p1986_p9), %s278_s7, 512  }
  0x94   : > { %1239 = vsyncadd (%p1986_p9), %s278_s7, 4294966784  ;;  %s862_s10 = sshll.u32 %s1608_s14, 3  ;;  %s1627_s6 = sadd.s32 1, %s1274_s21  ;;  %v1629_v0 = vld [vmem:[%s272_s15] sm:$0xff]  ;;  %v1631_v1 = vld [vmem:[%s272_s15 + $0x8] sm:$0xff] }
  0x95   : > { %s290_s26 = scalar_lea.vmem [#allocation9], %s1618_s18  ;;  %s1634_s30 = scalar_lea.vmem [#allocation10], %s862_s10 }
  0x96   : > { %s1636_s9 = scalar_lea.vmem [#allocation11], %s862_s10  ;;  %p864_p12 = scmp.ne.s32.totalorder %s1274_s21, 0 }
  0x97   : > { %s1297_s8 = smov (!%p864_p12), 127   ;;  %s1298_s28 = smov (!%p864_p12), 1   ;;  %v1299_v2 = vmov (!%p864_p12), 0.0   ;;  %v343_v3 = vlaneseq (!%p864_p12)  ;;  %v341_v5 = vrot.slane (!%p864_p12), %v1629_v0, 7  ;;  %v342_v6 = vrot.slane (!%p864_p12), %v1631_v1, 7 }
  0x98   : > { %338 = sbr.rel (%p864_p12) target bundleno = 286 (0x11e), region = 48  ;;  %371 = vrot.lane.b32.xlu1 (!%p864_p12), %v1629_v0, %s1297_s8  ;;  %362 = vrot.lane.b32.xlu0 (!%p864_p12), %v1629_v0, %s1298_s28  ;;  %339 = vst [vmem:[%s1634_s30] sm:$0xff] (!%p864_p12), %v1299_v2  ;;  %340 = vst [vmem:[%s1636_s9] sm:$0xff] (!%p864_p12), %v1299_v2  ;;  %v353_v8 = vrot.slane (!%p864_p12), %v1629_v0, 1  ;;  %v354_v9 = vrot.slane (!%p864_p12), %v1631_v1, 1  ;;  %vm396_vm3 = vcmp.ge.s32.totalorder (!%p864_p12), %v1629_v0, 0  ;;  %vm398_vm4 = vcmp.lt.s32.totalorder (!%p864_p12), %v1629_v0, 32 }
  0x99   : > { %v344_v4 = vshrl.u32 (!%p864_p12), %v343_v3, 7  ;;  %vm1652_vm7 = vmand (!%p864_p12), %vm396_vm3, %vm398_vm4  ;;  %vm397_vm13 = vcmp.ge.s32.totalorder (!%p864_p12), %v1631_v1, 0  ;;  %vm399_vm14 = vcmp.lt.s32.totalorder (!%p864_p12), %v1631_v1, 32  ;;  %v367_v21 = vand.u32 (!%p864_p12), 127, %v343_v3 }
  0x9a   : > { %v402_v17 = vsel (!%p864_p12), %vm1652_vm7, %v1629_v0, 0  ;;  %v1300_v22 = vmov (!%p864_p12), 1  }
  0x9b   : > { %vm345_vm0 = vcmp.lt.s32.totalorder (!%p864_p12), %v344_v4, 1  ;;  %vm349_vm1 = vcmp.eq.s32.totalorder (!%p864_p12), %v344_v4, 0  ;;  %vm355_vm2 = vcmp.lt.s32.totalorder (!%p864_p12), %v344_v4, 7  ;;  %v348_v12 = vadd.s32 (!%p864_p12), 8, %v344_v4 }
  0x9c   : > { %373 = vrot.lane.b32.xlu1 (!%p864_p12), %v1631_v1, %s1297_s8  ;;  %364 = vrot.lane.b32.xlu0 (!%p864_p12), %v1631_v1, %s1298_s28  ;;  %v347_v7 = vsel (!%p864_p12), %vm345_vm0, %v342_v6, %v341_v5  ;;  %v356_v11 = vsel (!%p864_p12), %vm355_vm2, %v353_v8, %v354_v9  ;;  %v346_v15 = vsel (!%p864_p12), %vm345_vm0, %v341_v5, %v342_v6  ;;  %vm1675_vm0 = vmand (!%p864_p12), %vm397_vm13, %vm399_vm14 }
  0x9d   : > { %v351_v10 = vsel (!%p864_p12), %vm349_vm1, 4294967295, %v347_v7  ;;  %vm422_vm8 = vcmp.ge.s32.totalorder (!%p864_p12), %v356_v11, 0  ;;  %vm424_vm9 = vcmp.lt.s32.totalorder (!%p864_p12), %v356_v11, 32  ;;  %v357_v16 = vsel (!%p864_p12), %vm355_vm2, %v354_v9, %v353_v8 }
  0x9e   : > { %vm408_vm5 = vcmp.ge.s32.totalorder (!%p864_p12), %v351_v10, 0  ;;  %vm410_vm6 = vcmp.lt.s32.totalorder (!%p864_p12), %v351_v10, 32  ;;  %vm359_vm11 = vcmp.eq.s32.totalorder (!%p864_p12), %v348_v12, 15  ;;  %vm1664_vm12 = vmand (!%p864_p12), %vm422_vm8, %vm424_vm9  ;;  %vm409_vm15 = vcmp.ge.s32.totalorder (!%p864_p12), %v346_v15, 0 }
  0x9f   : > { %vm1656_vm10 = vmand %vm408_vm5, %vm410_vm6  ;;  %vm411_vm1 = vcmp.lt.s32.totalorder %v346_v15, 32  ;;  %v361_v20 = vsel %vm359_vm11, 4294967295, %v357_v16  ;;  %v404_v23 = vshll.u32 %v1300_v22, %v402_v17  ;;  %v428_v24 = vsel %vm1664_vm12, %v356_v11, 0 }
  0xa0   : > { %v414_v19 = vsel %vm1656_vm10, %v351_v10, 0  ;;  %vm1680_vm2 = vmand %vm409_vm15, %vm411_vm1  ;;  %vm423_vm3 = vcmp.ge.s32.totalorder %v361_v20, 0  ;;  %vm425_vm4 = vcmp.lt.s32.totalorder %v361_v20, 32  ;;  %v430_v28 = vshll.u32 %v1300_v22, %v428_v24 }
  0xa1   : > { %v416_v26 = vshll.u32 %v1300_v22, %v414_v19  ;;  %vm375_vm5 = vcmp.eq.s32.totalorder %v367_v21, 127  ;;  %v406_v29 = vsel %vm1652_vm7, %v404_v23, 0  ;;  %v403_v30 = vsel %vm1675_vm0, %v1631_v1, 0  ;;  %vm1696_vm11 = vmand %vm423_vm3, %vm425_vm4 }
  0xa2   : > { %v415_v31 = vsel %vm1680_vm2, %v346_v15, 0  ;;  %vm1955_vm6 = vcmp.eq.s32.totalorder %v367_v21, 0  ;;  %vm378_vm8 = vcmp.eq.s32.totalorder %v351_v10, %v1629_v0  ;;  %vm380_vm9 = vcmp.eq.s32.totalorder %v356_v11, %v1629_v0 }
  0xa3   : > { %v418_v32 = vsel %vm1656_vm10, %v416_v26, 0  ;;  %vm379_vm7 = vcmp.eq.s32.totalorder %v346_v15, %v1631_v1  ;;  %vm381_vm13 = vcmp.eq.s32.totalorder %v361_v20, %v1631_v1  ;;  %v432_v36 = vsel %vm1664_vm12, %v430_v28, 0  ;;  %vm382_vm10 = vmand %vm378_vm8, %vm380_vm9 }
  0xa4   : > { %v405_v37 = vshll.u32 %v1300_v22, %v403_v30  ;;  %v417_v38 = vshll.u32 %v1300_v22, %v415_v31  ;;  %v420_v41 = vor.u32 %v418_v32, %v406_v29  ;;  %v429_v42 = vsel %vm1696_vm11, %v361_v20, 0  ;;  %vm1716_vm12 = vmand %vm379_vm7, %vm381_vm13 }
  0xa5   : > { %v431_v49 = vshll.u32 %v1300_v22, %v429_v42  ;;  %vm2003_vm13 = vcmp.eq.s32.totalorder %v367_v21, 0 }
  0xa6   : > { %v407_v46 = vsel %vm1675_vm0, %v405_v37, 0  ;;  %v419_v48 = vsel %vm1680_vm2, %v417_v38, 0  ;;  %v434_v51 = vor.u32 %v432_v36, %v420_v41 }
  0xa7   : > { %v421_v58 = vor.u32 %v419_v48, %v407_v46  ;;  %v433_v61 = vsel %vm1696_vm11, %v431_v49, 0 }
  0xa9   : > { %v435_v3 = vor.u32 %v433_v61, %v421_v58 }
 0x10a   : > { %v372_v34 = vpop.permute.xlu1 %371  ;;  %v363_v35 = vpop.permute.xlu0 %362 }
 0x10b   : > { %v376_v39 = vsel %vm375_vm5, 4294967295, %v372_v34  ;;  %v369_v40 = vsel %vm1955_vm6, 4294967295, %v363_v35 }
 0x10c   : > { %vm388_vm14 = vcmp.eq.s32.totalorder %v376_v39, %v1629_v0  ;;  %vm450_vm15 = vcmp.ge.s32.totalorder %v376_v39, 0  ;;  %vm452_vm1 = vcmp.lt.s32.totalorder %v376_v39, 32  ;;  %vm384_vm3 = vcmp.eq.s32.totalorder %v369_v40, %v1629_v0 }
 0x10d   : > { %vm1720_vm4 = vmand %vm450_vm15, %vm452_vm1  ;;  %vm436_vm8 = vcmp.ge.s32.totalorder %v369_v40, 0  ;;  %vm438_vm9 = vcmp.lt.s32.totalorder %v369_v40, 32 }
 0x10e   : > { %vm386_vm6 = vmand %vm382_vm10, %vm384_vm3  ;;  %v374_v45 = vpop.permute.xlu1 %373  ;;  %v365_v47 = vpop.permute.xlu0 %364  ;;  %v456_v50 = vsel %vm1720_vm4, %v376_v39, 0 }
 0x10f   : > { %vm390_vm7 = vmand %vm386_vm6, %vm388_vm14  ;;  %v377_v52 = vsel %vm375_vm5, 4294967295, %v374_v45  ;;  %v370_v53 = vsel %vm2003_vm13, 4294967295, %v365_v47  ;;  %v458_v59 = vshll.u32 %v1300_v22, %v456_v50 }
 0x110   : > { %v392_v54 = vsel %vm390_vm7, %v1629_v0, 4294967295  ;;  %vm1736_vm0 = vmand %vm436_vm8, %vm438_vm9  ;;  %vm389_vm2 = vcmp.eq.s32.totalorder %v377_v52, %v1631_v1  ;;  %vm451_vm10 = vcmp.ge.s32.totalorder %v377_v52, 0  ;;  %vm453_vm15 = vcmp.lt.s32.totalorder %v377_v52, 32 }
 0x111   : > { %394 = vst [vmem:[#allocation3] sm:$0xff] %v392_v54  ;;  %v442_v56 = vsel %vm1736_vm0, %v369_v40, 0  ;;  %vm1743_vm6 = vmand %vm451_vm10, %vm453_vm15  ;;  %vm385_vm5 = vcmp.eq.s32.totalorder %v370_v53, %v1631_v1  ;;  %vm437_vm14 = vcmp.ge.s32.totalorder %v370_v53, 0  ;;  %vm439_vm3 = vcmp.lt.s32.totalorder %v370_v53, 32 }
 0x112   : > { %v444_v60 = vshll.u32 %v1300_v22, %v442_v56  ;;  %vm387_vm1 = vmand %vm1716_vm12, %vm385_vm5  ;;  %v457_v62 = vsel %vm1743_vm6, %v377_v52, 0  ;;  %v460_v5 = vsel %vm1720_vm4, %v458_v59, 0 }
 0x113   : > { %vm391_vm8 = vmand %vm387_vm1, %vm389_vm2  ;;  %v459_v6 = vshll.u32 %v1300_v22, %v457_v62 }
 0x114   : > { %v446_v63 = vsel %vm1736_vm0, %v444_v60, 0  ;;  %v393_v0 = vsel %vm391_vm8, %v1631_v1, 4294967295  ;;  %vm441_vm9 = vmand %vm437_vm14, %vm439_vm3 }
 0x115   : > { %v448_v2 = vor.u32 %v446_v63, %v434_v51  ;;  %395 = vst [vmem:[#allocation3 + $0x8] sm:$0xff] %v393_v0  ;;  %v443_v4 = vsel %vm441_vm9, %v370_v53, 0  ;;  %v461_v11 = vsel %vm1743_vm6, %v459_v6, 0 }
 0x116   : > { %v445_v7 = vshll.u32 %v1300_v22, %v443_v4 }
 0x117   : > { %v462_v8 = vor.u32 %v460_v5, %v448_v2 }
 0x118   : > { %v447_v9 = vsel %vm441_vm9, %v445_v7, 0 }
 0x119   : > { %464 = vst [vmem:[#allocation2] sm:$0xff] %v462_v8  ;;  %v449_v10 = vor.u32 %v447_v9, %v435_v3 }
 0x11b   : > { %v463_v1 = vor.u32 %v461_v11, %v449_v10 }
 0x11d   : > { %465 = vst [vmem:[#allocation2 + $0x8] sm:$0xff] %v463_v1 }
 0x11e PF: > { %v468_v12 = vld [vmem:[%s290_s26] sm:$0xff]  ;;  %v469_v13 = vld [vmem:[%s290_s26 + $0x8] sm:$0xff]  ;;  %s526_s21 = ssub.s32 0, %s1627_s6  ;;  %p525_p10 = scmp.lt.s32.totalorder %s1627_s6, 0  ;;  %v520_v43 = vstv %s1627_s6  ;;  %vm1302_vm7 = vmmov 1  }
 0x11f   : > { %v466_v14 = vld [vmem:[%s281_s12] sm:$0xff]  ;;  %v470_v15 = vmax.f32 %v468_v12, %v469_v13  ;;  %v467_v16 = vld [vmem:[%s281_s12 + $0x8] sm:$0xff]  ;;  %s865_s1 = smin.u32 %s526_s21, %s1627_s6  ;;  %s1301_s15 = smov 1  }
 0x120   : > { %v482_v17 = vmax.f32 %v466_v14, %v467_v16  ;;  %s528_s27 = sand.u32 31, %s865_s1   ;;  %v518_v42 = vld [vmem:[#allocation3] sm:$0xff]  ;;  %v523_v44 = vld [vmem:[#allocation2] sm:$0xff]  ;;  %v519_v50 = vld [vmem:[#allocation3 + $0x8] sm:$0xff]  ;;  %s870_s6 = sshll.u32 %s1278_s22, 7 }
 0x121   : > { %471 = vmax.xlane.f32.xlu0 %v470_v15  ;;  %s529_s11 = ssub.s32 0, %s528_s27  ;;  %vm1779_vm11 = vcmp.eq.s32.totalorder %v518_v42, %v520_v43  ;;  %vm1783_vm12 = vcmp.eq.s32.totalorder %v519_v50, %v520_v43  ;;  %s666_s26 = sshll.u32 %s1634_s30, 4  ;;  %s1833_s26 = int_to_ptr.vmem [resolvable:$true] %s666_s26 }
 0x122   : > { %s2039_s11 = smov (!%p525_p10, %s529_s11), %s528_s27  ;;  %vm543_vm13 = vmxor %vm1779_vm11, %vm1302_vm7  ;;  %s1831_s1 = scalar_lea.hbm %s1934_s3, %s870_s6 }
 0x123   : > { %p867_p0 = scmp.lt.s32.totalorder %s2039_s11, 0  ;;  %s535_s29 = sadd.s32 32, %s2039_s11  ;;  %vm544_vm2 = vmxor %vm1783_vm12, %vm1302_vm7 }
 0x124   : > { %v524_v46 = vld [vmem:[#allocation2 + $0x8] sm:$0xff]  ;;  %s679_s27 = sshll.u32 %s1636_s9, 4  ;;  %p2016_p3 = scmp.ne.s32.totalorder %s1976_s13, 0  ;;  %s1869_s27 = int_to_ptr.vmem [resolvable:$true] %s679_s27 }
 0x125   : > { %483 = vmax.xlane.f32.xlu0 %v482_v17  ;;  %s2041_s29 = smov (!%p867_p0, %s535_s29), %s2039_s11  ;;  %s648_s11 = scalar_lea.sflag [#allocation6], %s1608_s14 }
 0x126   : > { %s537_s4 = sshll.u32 %s1301_s15, %s2041_s29  ;;  %s1132_s29 = scalar_lea.vmem %s1833_s26, 128 }
 0x127   : > { %v538_v45 = vstv %s537_s4  ;;  %p1133_p4 = scmp.ne.s32.totalorder %s1833_s26, %s1132_s29 }
 0x128   : > { %v539_v52 = vand.u32 %v538_v45, %v523_v44  ;;  %v540_v56 = vand.u32 %v538_v45, %v524_v46 }
 0x129   : > { %p1134_p6 = pnand %p1133_p4, %p2016_p3 }
 0x12a   : > { %vm541_vm4 = vcmp.ne.s32.totalorder %v539_v52, 0  ;;  %vm542_vm0 = vcmp.ne.s32.totalorder %v540_v56, 0 }
 0x12b   : > { %vm1791_vm10 = vmand %vm541_vm4, %vm543_vm13  ;;  %p1135_p2 = pneg %p1134_p6 }
 0x12c   : > { %vm1795_vm15 = vmand %vm542_vm0, %vm544_vm2 }
 0x1ae   : > { %v472_v18 = vpop.xlane.xlu0 %471 }
 0x1af   : > { %v473_v19 = vrot.slane %v472_v18, 4 }
 0x1b1   : > { %v474_v20 = vmax.f32 %v472_v18, %v473_v19 }
 0x1b2   : > { %v484_v21 = vpop.xlane.xlu0 %483 }
 0x1b3   : > { %v475_v22 = vrot.slane %v474_v20, 2  ;;  %v485_v23 = vrot.slane %v484_v21, 4 }
 0x1b5   : > { %v486_v24 = vmax.f32 %v484_v21, %v485_v23  ;;  %v476_v25 = vmax.f32 %v474_v20, %v475_v22 }
 0x1b7   : > { %v487_v26 = vrot.slane %v486_v24, 2  ;;  %v477_v27 = vrot.slane %v476_v25, 1 }
 0x1b9   : > { %v478_v28 = vmax.f32 %v476_v25, %v477_v27  ;;  %v488_v29 = vmax.f32 %v486_v24, %v487_v26 }
 0x1bb   : > { %875 = vpush %v478_v28  ;;  %v489_v30 = vrot.slane %v488_v29, 1 }
 0x1bd   : > { %v490_v31 = vmax.f32 %v488_v29, %v489_v30 }
 0x1bf   : > { %877 = vpush %v490_v31 }
 0x1ec   : > { %s876_s5 = spop %875 }
 0x1ed   : > { %v480_v32 = vstv %s876_s5  ;;  %s1303_s5 = smov [#allocation10]  }
 0x1ee   : > { %v481_v33 = vmax.f32 %v480_v32, 0.0 }
 0x1f0   : > { %v494_v34 = vsub.f32 %v468_v12, %v481_v33  ;;  %v495_v35 = vsub.f32 %v469_v13, %v481_v33  ;;  %v510_v36 = vsub.f32 0.0, %v481_v33  ;;  %s878_s23 = spop %877 }
 0x1f1   : > { %v492_v37 = vstv %s878_s23  ;;  %s1136_s23 = sshll.u32 %s1303_s5, 4  ;;  %s1137_s23 = int_to_ptr.vmem [resolvable:$false] %s1136_s23 }
 0x1f2   : > { %v498_v38 = vmul.f32 1.442695, %v494_v34  ;;  %v500_v39 = vmul.f32 1.442695, %v495_v35  ;;  %v511_v40 = vmul.f32 1.442695, %v510_v36  ;;  %p1139_p7 = scmp.lt.s32.totalorder %s1833_s26, %s1137_s23 }
 0x1f3   : > { %v493_v41 = vmax.f32 %v492_v37, 0.0  ;;  %s1138_s15 = scalar_lea.vmem %s1137_s23, 256 }
 0x1f4   : > { %1016 = vpow2.f32 %v498_v38  ;;  %p1140_p8 = scmp.lt.s32.totalorder %s1138_s15, %s1132_s29 }
 0x1f5   : > { %1018 = vpow2.f32 %v500_v39  ;;  %v496_v47 = vsub.f32 %v466_v14, %v493_v41  ;;  %v497_v48 = vsub.f32 %v467_v16, %v493_v41  ;;  %v513_v49 = vsub.f32 0.0, %v493_v41 }
 0x1f6   : > { %1020 = vpow2.f32 %v511_v40  ;;  %v516_v0 = vsub.f32 %v493_v41, %v481_v33  ;;  %p1141_p5 = por %p1140_p8, %p1139_p7 }
 0x1f7   : > { %v502_v53 = vmul.f32 1.442695, %v496_v47  ;;  %v504_v54 = vmul.f32 1.442695, %v497_v48  ;;  %v514_v55 = vmul.f32 1.442695, %v513_v49  ;;  %v506_v59 = vsub.f32 %v494_v34, %v496_v47 }
 0x1f8   : > { %v507_v62 = vsub.f32 %v495_v35, %v497_v48  ;;  %p1142_p11 = pnand %p1141_p5, %p1135_p2 }
 0x1f9   : > { %1022 = vpow2.f32 %v502_v53 }
 0x1fa   : > { %1024 = vpow2.f32 %v504_v54 }
 0x1fb   : > { %1026 = vpow2.f32 %v514_v55 }
 0x1fe   : > { %v1017_v60 = vpop.eup %1016 }
 0x1ff   : > { %v1019_v63 = vpop.eup %1018  ;;  %v508_v2 = vmul.f32 %v1017_v60, %v506_v59 }
 0x200   : > { %v1021_v3 = vpop.eup %1020  ;;  %v509_v4 = vmul.f32 %v1019_v63, %v507_v62 }
 0x201   : > { %v548_v5 = vsel %vm1791_vm10, %v1017_v60, %v1021_v3  ;;  %v549_v6 = vsel %vm1795_vm15, %v1019_v63, %v1021_v3  ;;  %v517_v7 = vmul.f32 %v1021_v3, %v516_v0  ;;  %v598_v20 = vsel %vm1779_vm11, %v1017_v60, %v1021_v3 }
 0x202   : > { %v550_v8 = vadd.f32 %v549_v6, %v548_v5  ;;  %v599_v21 = vsel %vm1783_vm12, %v1019_v63, %v1021_v3 }
 0x203   : > { %v1023_v9 = vpop.eup %1022  ;;  %v574_v10 = vsel %vm1791_vm10, %v508_v2, %v517_v7  ;;  %v575_v11 = vsel %vm1795_vm15, %v509_v4, %v517_v7  ;;  %v600_v22 = vadd.f32 %v599_v21, %v598_v20  ;;  %v624_v23 = vsel %vm1779_vm11, %v508_v2, %v517_v7 }
 0x204   : > { %v1025_v1 = vpop.eup %1024  ;;  %551 = vadd.xlane.f32.xlu1 %v550_v8  ;;  %v576_v12 = vadd.f32 %v575_v11, %v574_v10  ;;  %v625_v24 = vsel %vm1783_vm12, %v509_v4, %v517_v7 }
 0x205   : > { %v1027_v13 = vpop.eup %1026  ;;  %v626_v25 = vadd.f32 %v625_v24, %v624_v23 }
 0x206   : > { %577 = vadd.xlane.f32.xlu0 %v576_v12  ;;  %v561_v14 = vsel %vm1791_vm10, %v1023_v9, %v1027_v13  ;;  %v562_v15 = vsel %vm1795_vm15, %v1025_v1, %v1027_v13  ;;  %v611_v16 = vsel %vm1779_vm11, %v1023_v9, %v1027_v13  ;;  %v612_v17 = vsel %vm1783_vm12, %v1025_v1, %v1027_v13 }
 0x207   : > { %v563_v18 = vadd.f32 %v562_v15, %v561_v14  ;;  %v613_v19 = vadd.f32 %v612_v17, %v611_v16  ;;  %v547_v17 = vld [vmem:[%s1634_s30] sm:$0xff] }
 0x209   : > { %564 = vadd.xlane.f32.xlu1 %v563_v18 }
 0x20a   : > { %614 = vadd.xlane.f32.xlu0 %v613_v19 }
 0x20d   : > { %601 = vadd.xlane.f32.xlu1 %v600_v22 }
 0x211   : > { %627 = vadd.xlane.f32.xlu1 %v626_v25 }
 0x291   : > { %v552_v26 = vpop.xlane.xlu1 %551 }
 0x292   : > { %v553_v27 = vrot.slane %v552_v26, 4 }
 0x293   : > { %v578_v28 = vpop.xlane.xlu0 %577 }
 0x294   : > { %v554_v29 = vadd.f32 %v553_v27, %v552_v26  ;;  %v579_v30 = vrot.slane %v578_v28, 4 }
 0x296   : > { %v555_v31 = vrot.slane %v554_v29, 2  ;;  %v580_v32 = vadd.f32 %v579_v30, %v578_v28  ;;  %v565_v33 = vpop.xlane.xlu1 %564 }
 0x297   : > { %v566_v34 = vrot.slane %v565_v33, 4  ;;  %v615_v35 = vpop.xlane.xlu0 %614 }
 0x298   : > { %v581_v36 = vrot.slane %v580_v32, 2  ;;  %v616_v37 = vrot.slane %v615_v35, 4  ;;  %v556_v38 = vadd.f32 %v555_v31, %v554_v29 }
 0x299   : > { %v567_v39 = vadd.f32 %v566_v34, %v565_v33 }
 0x29a   : > { %v617_v40 = vadd.f32 %v616_v37, %v615_v35  ;;  %v602_v41 = vpop.xlane.xlu1 %601  ;;  %v557_v42 = vrot.slane %v556_v38, 1  ;;  %v582_v43 = vadd.f32 %v581_v36, %v580_v32 }
 0x29b   : > { %v568_v44 = vrot.slane %v567_v39, 2  ;;  %v603_v45 = vrot.slane %v602_v41, 4 }
 0x29c   : > { %v618_v46 = vrot.slane %v617_v40, 2  ;;  %v558_v47 = vadd.f32 %v557_v42, %v556_v38  ;;  %v583_v52 = vrot.slane %v582_v43, 1 }
 0x29d   : > { %v604_v48 = vadd.f32 %v603_v45, %v602_v41  ;;  %v569_v49 = vadd.f32 %v568_v44, %v567_v39 }
 0x29e   : > { %v619_v50 = vadd.f32 %v618_v46, %v617_v40  ;;  %v628_v51 = vpop.xlane.xlu1 %627  ;;  %879 = vpush %v558_v47  ;;  %v584_v59 = vadd.f32 %v583_v52, %v582_v43 }
 0x29f   : > { %v605_v53 = vrot.slane %v604_v48, 2  ;;  %v629_v54 = vrot.slane %v628_v51, 4  ;;  %v570_v55 = vrot.slane %v569_v49, 1 }
 0x2a0   : > { %v620_v60 = vrot.slane %v619_v50, 1 }
 0x2a1   : > { %v630_v56 = vadd.f32 %v629_v54, %v628_v51  ;;  %v571_v57 = vadd.f32 %v570_v55, %v569_v49  ;;  %v606_v58 = vadd.f32 %v605_v53, %v604_v48 }
 0x2a2   : > { %v621_v2 = vadd.f32 %v620_v60, %v619_v50 }
 0x2a3   : > { %v631_v61 = vrot.slane %v630_v56, 2  ;;  %881 = vpush %v571_v57  ;;  %v607_v62 = vrot.slane %v606_v58, 1 }
 0x2a4   : > { %883 = vpush %v584_v59 }
 0x2a5   : > { %v632_v63 = vadd.f32 %v631_v61, %v630_v56  ;;  %v608_v0 = vadd.f32 %v607_v62, %v606_v58 }
 0x2a7   : > { %885 = vpush %v608_v0  ;;  %v633_v3 = vrot.slane %v632_v63, 1 }
 0x2a8   : > { %887 = vpush %v621_v2 }
 0x2a9   : > { %v634_v4 = vadd.f32 %v633_v3, %v632_v63 }
 0x2ab   : > { %889 = vpush %v634_v4 }
 0x2cf   : > { %s880_s17 = spop %879 }
 0x2d0   : > { %v560_v5 = vstv %s880_s17 }
 0x2d1   : > { %1028 = vlog2.f32 %v560_v5 }
 0x2d2   : > { %1030 = vrcp.f32 %v560_v5 }
 0x2d4   : > { %s882_s18 = spop %881 }
 0x2d5   : > { %v573_v6 = vstv %s882_s18  ;;  %s884_s7 = spop %883 }
 0x2d6   : > { %1032 = vlog2.f32 %v573_v6  ;;  %v586_v13 = vstv %s884_s7 }
 0x2d8   : > { %s886_s12 = spop %885 }
 0x2d9   : > { %v610_v7 = vstv %s886_s12  ;;  %s888_s10 = spop %887 }
 0x2da   : > { %1034 = vrcp.f32 %v610_v7  ;;  %v623_v8 = vstv %s888_s10 }
 0x2db   : > { %1036 = vlog2.f32 %v610_v7  ;;  %v1029_v9 = vpop.eup %1028 }
 0x2dc   : > { %1038 = vlog2.f32 %v623_v8  ;;  %v1031_v10 = vpop.eup %1030  ;;  %v592_v1 = vmul.f32 0.6931472, %v1029_v9  ;;  %s890_s8 = spop %889 }
 0x2dd   : > { %v588_v14 = vmul.f32 %v1031_v10, %v586_v13  ;;  %v636_v24 = vstv %s890_s8 }
 0x2e0   : > { %v1033_v11 = vpop.eup %1032 }
 0x2e1   : > { %v590_v12 = vmul.f32 0.6931472, %v1033_v11 }
 0x2e3   : > { %v593_v15 = vsub.f32 %v590_v12, %v592_v1 }
 0x2e4   : > { %v1035_v16 = vpop.eup %1034 }
 0x2e5   : > { %v1037_v18 = vpop.eup %1036  ;;  %v594_v19 = vadd.f32 %v593_v15, %v588_v14  ;;  %v638_v25 = vmul.f32 %v1035_v16, %v636_v24 }
 0x2e6   : > { %v1039_v20 = vpop.eup %1038  ;;  %v642_v21 = vmul.f32 0.6931472, %v1037_v18 }
 0x2e7   : > { %v640_v22 = vmul.f32 0.6931472, %v1039_v20  ;;  %v595_v23 = vadd.f32 %v594_v19, %v547_v17 }
 0x2e9   : > { %v643_v26 = vsub.f32 %v640_v22, %v642_v21  ;;  %596 = vst [vmem:[%s1634_s30] sm:$0xff] %v595_v23 }
 0x2ea   : > { %1145 = shalt.err (!%p1142_p11)
}
 0x2eb   : > { %s1146_s30 = scalar_lea.hbm %s1831_s1, 128  ;;  %s1150_s18 = scalar_lea.hbm %s1934_s3, 256 }
 0x2ec   : > { %p1147_p13 = scmp.ne.s32.totalorder %s1831_s1, %s1146_s30  ;;  %p1151_p12 = scmp.lt.u32.totalorder %s1831_s1, %s1934_s3 }
 0x2ed   : > { %p1152_p10 = scmp.lt.u32.totalorder %s1150_s18, %s1146_s30  ;;  %p1154_p4 = scmp.lt.u32.totalorder %s1146_s30, %s1831_s1 }
 0x2ee   : > { %p1148_p1 = pnand %p1147_p13, %p2016_p3 }
 0x2ef   : > { %p1153_p0 = por %p1152_p10, %p1151_p12 }
 0x2f0   : > { %p1149_p9 = pneg %p1148_p1 }
 0x2f1   : > { %p1155_p6 = por %p1154_p4, %p1153_p0 }
 0x2f3   : > { %p1156_p2 = pnand %p1155_p6, %p1149_p9 }
 0x2f5   : > { %1159 = shalt.err (!%p1156_p2)
}
 0x2f6   : > { %897 = dma.vmem_to_hbm [thread:$0]  (%p2016_p3), %s1833_s26, 128, %s1831_s1, %s648_s11   ;;  %v597_v27 = vld [vmem:[%s1636_s9] sm:$0xff]  ;;  %v644_v28 = vadd.f32 %v643_v26, %v638_v25 }
 0x2f7   : > { %s2017_s28 = sld [smem:[#allocation26_spill]]  ;;  %s653_s29 = scalar_lea.sflag [#allocation12], %s1608_s14 }
 0x2f8   : > { %v645_v29 = vadd.f32 %v644_v28, %v597_v27  ;;  %s1160_s5 = scalar_lea.vmem %s1869_s27, 128  ;;  %s1304_s26 = smov [#allocation11]  }
 0x2f9   : > { %p1161_p7 = scmp.ne.s32.totalorder %s1869_s27, %s1160_s5  ;;  %s1164_s22 = sshll.u32 %s1304_s26, 4  ;;  %s1165_s22 = int_to_ptr.vmem [resolvable:$false] %s1164_s22 }
 0x2fa   : > { %646 = vst [vmem:[%s1636_s9] sm:$0xff] %v645_v29  ;;  %s1166_s1 = scalar_lea.vmem %s1165_s22, 256  ;;  %p1167_p11 = scmp.lt.s32.totalorder %s1869_s27, %s1165_s22 }
 0x2fb   : > { %p1162_p8 = pnand %p1161_p7, %p2016_p3  ;;  %p1168_p13 = scmp.lt.s32.totalorder %s1166_s1, %s1160_s5 }
 0x2fd   : > { %s1865_s21 = scalar_lea.hbm %s2017_s28, %s870_s6  ;;  %p1163_p5 = pneg %p1162_p8 }
 0x2fe   : > { %p1169_p1 = por %p1168_p13, %p1167_p11 }
 0x300   : > { %p1170_p9 = pnand %p1169_p1, %p1163_p5 }
 0x302   : > { %1173 = shalt.err (!%p1170_p9)
}
 0x303   : > { %s1174_s14 = scalar_lea.hbm %s1865_s21, 128  ;;  %s1178_s11 = scalar_lea.hbm %s2017_s28, 256 }
 0x304   : > { %p1175_p12 = scmp.ne.s32.totalorder %s1865_s21, %s1174_s14  ;;  %p1179_p4 = scmp.lt.u32.totalorder %s1865_s21, %s2017_s28 }
 0x305   : > { %p1180_p6 = scmp.lt.u32.totalorder %s1178_s11, %s1174_s14  ;;  %p1182_p7 = scmp.lt.u32.totalorder %s1174_s14, %s1865_s21 }
 0x306   : > { %p1176_p10 = pnand %p1175_p12, %p2016_p3 }
 0x307   : > { %p1181_p2 = por %p1180_p6, %p1179_p4 }
 0x308   : > { %p1177_p0 = pneg %p1176_p10 }
 0x309   : > { %p1183_p8 = por %p1182_p7, %p1181_p2 }
 0x30b   : > { %p1184_p5 = pnand %p1183_p8, %p1177_p0 }
 0x30d   : > { %1187 = shalt.err (!%p1184_p5)
}
 0x30e   : > { %898 = dma.vmem_to_hbm [thread:$0]  (%p2016_p3), %s1869_s27, 128, %s1865_s21, %s653_s29  }
 0x30f PF: > { %s2018_s30 = sld [smem:[#allocation18_spill]]  ;;  %s2019_s4 = sld [smem:[#allocation24_spill]] }
 0x310   : > { %p919_p11 = scmp.ge.s32.totalorder %s1290_s25, 2 }
 0x315   : > { %s691_s17 = sand.u32 1, %s2018_s30   ;;  %p2020_p13 = scmp.ne.s32.totalorder %s2019_s4, 0 }
 0x316   : > { %s692_s18 = scalar_lea.sflag [#allocation6], %s691_s17 }
 0x317   : > { %p912_p1 = pnand %p919_p11, %p2020_p13 }
 0x319   : > { %1241 = dma.done.wait (!%p912_p1), %s692_s18, 128  }
 0x31a   : > { %1243 = vsyncadd (!%p912_p1), %s692_s18, 4294967168  ;;  %s701_s7 = scalar_lea.sflag [#allocation12], %s691_s17 }
 0x31b   : > { %1245 = dma.done.wait (!%p912_p1), %s701_s7, 128  }
 0x31c   : > { %1247 = vsyncadd (!%p912_p1), %s701_s7, 4294967168  ;;  %s27_s25 = sadd.s32 1, %s1290_s25   ;;  %s2021_s13 = sld [smem:[#allocation17_spill]] }
 0x31d   : > { %p24_p9 = scmp.ge.s32.totalorder %s27_s25, 8   ;;  %s2022_s17 = sld [smem:[#allocation22_spill]] }
 0x31e   : > { %s2023_s27 = sld [smem:[#allocation23_spill]]  ;;  %s2024_s21 = sld [smem:[#allocation19_spill]] }
 0x31f   : > { %s2025_s23 = sld [smem:[#allocation20_spill]]  ;;  %s2026_s12 = sld [smem:[#allocation21_spill]] }
 0x320   : > { %s2027_s15 = smov %s1254_s16  ;;  %s2029_s18 = smov %s1266_s19 }
 0x321   : > { %s2030_s19 = smov %s1270_s20  ;;  %s2032_s22 = smov %s1286_s24 }
 0x322   : > { %s2028_s16 = smov %s2021_s13  ;;  %26 = sbr.rel (!%p24_p9) target bundleno = 16 (0x10), region = 122 }
 0x324   : > { %s2031_s20 = smov %s2023_s27 }
 0x325   : > { %s2033_s24 = smov %s2026_s12 }
 0x329   :  { %706 = vsyncpa [#allocation5], 1 }
 0x32a   :  { %708 = vsyncpa [#allocation5 + $0x1], 1 }
 0x32b   :  { %709 = vsyncpa [#allocation8], 1 }
 0x32c   :  { %711 = vsyncpa [#allocation8 + $0x1], 1 }
 0x32d   :  { %712 = vsyncpa [#allocation6], 1 }
 0x32e   :  { %714 = vsyncpa [#allocation6 + $0x1], 1 }
 0x32f   :  { %715 = vsyncpa [#allocation12], 1 }
 0x330   :  { %717 = vsyncpa [#allocation12 + $0x1], 1 }

</bundles_post_ra>
